<compile_context>
chip_gen: v6e
topology: v6e:2x2x1
jax: 0.10.0
libtpu: 0.0.40
codegen_flags: <defaults>
</compile_context>

<pallas_src>
import functools
import math

import jax
import jax.numpy as jnp
from jax.experimental import pallas as pl
from jax.experimental.pallas import tpu as pltpu

_MXU_DTYPE = jnp.bfloat16      # MXU operand dtype; accumulation stays f32
_NEG_INF = -1e30               # finite mask sentinel (safe w/ bf16 & padding)


def _default_vmem_limit():
    cap = 64 * 1024 * 1024
    try:
        cap = int(getattr(pltpu.get_tpu_info(), "vmem_capacity_bytes", cap))
    except Exception:
        pass
    # ~96 MiB on v5e/v6e (128 MiB VMEM), ~48 MiB on v7x (64 MiB VMEM)
    return int(min(cap * 3 // 4, 100 * 1024 * 1024))


_VMEM_LIMIT = _default_vmem_limit()


def _layernorm(x, w, b, eps=1e-5):
    mu = jnp.mean(x, axis=-1, keepdims=True)
    var = jnp.mean((x - mu) ** 2, axis=-1, keepdims=True)
    return (x - mu) * jax.lax.rsqrt(var + eps) * w + b


def _gelu_exact(x):
    # PyTorch nn.GELU() default (erf-based)
    return 0.5 * x * (1.0 + jax.lax.erf(x * (1.0 / math.sqrt(2.0))))


# --------------------------------------------------------------------------
# Transformer block kernel: x = x + attn(ln_1(x)); x = x + mlp(ln_2(x))
# --------------------------------------------------------------------------
def gpt_block_kernel(x_ref,
                     ln1w_ref, ln1b_ref,
                     wq_ref, wk_ref, wv_ref, bq_ref, bk_ref, bv_ref,
                     wproj_ref, bproj_ref,
                     ln2w_ref, ln2b_ref,
                     wfc_ref, bfc_ref, wfcp_ref, bfcp_ref,
                     o_ref, *, n_head, tq):
    qi = pl.program_id(1)
    C = x_ref.shape[2]
    hd = C // n_head
    scale = 1.0 / math.sqrt(hd)

    # ----- query tile ------------------------------------------------------
    q_start = pl.multiple_of(qi * tq, tq)
    xq = x_ref[0, pl.ds(q_start, tq), :].astype(jnp.float32)        # (tq, C)

    hq = _layernorm(xq, ln1w_ref[...], ln1b_ref[...]).astype(_MXU_DTYPE)
    q = jnp.dot(hq, wq_ref[...], preferred_element_type=jnp.float32) + bq_ref[...]
    qh = jnp.transpose(q.reshape(tq, n_head, hd), (1, 0, 2)).astype(_MXU_DTYPE)

    # hoisted iotas for the per-tile causal mask
    row_ids = q_start + jax.lax.broadcasted_iota(jnp.int32, (tq, tq), 0)
    col_base = jax.lax.broadcasted_iota(jnp.int32, (tq, tq), 1)

    # ----- online-softmax loop over KV tiles (causal: only tiles 0..qi) -----
    def kv_step(j, carry):
        m_prev, l_prev, acc_prev = carry
        k_start = pl.multiple_of(j * tq, tq)
        xk = x_ref[0, pl.ds(k_start, tq), :].astype(jnp.float32)    # (tk, C)
        hk = _layernorm(xk, ln1w_ref[...], ln1b_ref[...]).astype(_MXU_DTYPE)
        k = jnp.dot(hk, wk_ref[...], preferred_element_type=jnp.float32) + bk_ref[...]
        v = jnp.dot(hk, wv_ref[...], preferred_element_type=jnp.float32) + bv_ref[...]
        kh = jnp.transpose(k.reshape(tq, n_head, hd), (1, 0, 2)).astype(_MXU_DTYPE)
        vh = jnp.transpose(v.reshape(tq, n_head, hd), (1, 0, 2)).astype(_MXU_DTYPE)

        # batched-head scores: (H, tq, tk)
        s = jnp.einsum('hqd,hkd->hqk', qh, kh,
                       preferred_element_type=jnp.float32) * scale
        causal = (k_start + col_base) <= row_ids                    # (tq, tk)
        s = jnp.where(causal[None, :, :], s, _NEG_INF)

        m_new = jnp.maximum(m_prev, jnp.max(s, axis=-1, keepdims=True))
        alpha = jnp.exp(m_prev - m_new)
        p = jnp.exp(s - m_new)
        l_new = alpha * l_prev + jnp.sum(p, axis=-1, keepdims=True)
        acc_new = alpha * acc_prev + jnp.einsum(
            'hqk,hkd->hqd', p.astype(_MXU_DTYPE), vh,
            preferred_element_type=jnp.float32)
        return m_new, l_new, acc_new

    m0 = jnp.full((n_head, tq, 1), _NEG_INF, jnp.float32)
    l0 = jnp.zeros((n_head, tq, 1), jnp.float32)
    a0 = jnp.zeros((n_head, tq, hd), jnp.float32)
    _, l_fin, acc = jax.lax.fori_loop(0, qi + 1, kv_step, (m0, l0, a0))

    # normalize with EUP reciprocal, merge heads back to (tq, C)
    att = acc * pl.reciprocal(l_fin, approx=True)
    att = jnp.transpose(att, (1, 0, 2)).reshape(tq, C).astype(_MXU_DTYPE)
    att = jnp.dot(att, wproj_ref[...],
                  preferred_element_type=jnp.float32) + bproj_ref[...]
    x1 = xq + att

    # ----- MLP --------------------------------------------------------------
    h2 = _layernorm(x1, ln2w_ref[...], ln2b_ref[...]).astype(_MXU_DTYPE)
    h2 = jnp.dot(h2, wfc_ref[...],
                 preferred_element_type=jnp.float32) + bfc_ref[...]
    h2 = _gelu_exact(h2).astype(_MXU_DTYPE)
    h2 = jnp.dot(h2, wfcp_ref[...],
                 preferred_element_type=jnp.float32) + bfcp_ref[...]

    o_ref[0] = (x1 + h2).astype(o_ref.dtype)


def gpt_block(x, params, *, n_head, tq=None):
    """One transformer block. x: (B, T, C)."""
    B, T, C = x.shape
    if tq is None:
        tq = min(T, 128)
    assert T % tq == 0 and C % n_head == 0
    n_q = T // tq

    in_specs = [pl.BlockSpec((1, T, C), lambda b, qi: (b, 0, 0))]
    for p in params:
        # weights / LN params / biases: whole array resident each grid step
        in_specs.append(pl.BlockSpec(p.shape, lambda b, qi: (0, 0)))

    return pl.pallas_call(
        functools.partial(gpt_block_kernel, n_head=n_head, tq=tq),
        out_shape=jax.ShapeDtypeStruct((B, T, C), x.dtype),
        grid=(B, n_q),
        in_specs=in_specs,
        out_specs=pl.BlockSpec((1, tq, C), lambda b, qi: (b, qi, 0)),
        compiler_params=pltpu.CompilerParams(
            dimension_semantics=("parallel", "parallel"),
            vmem_limit_bytes=_VMEM_LIMIT),
    )(x, *params)


# --------------------------------------------------------------------------
# Final kernel: logits = lm_head(ln_f(x)), tiled over (B, T-tiles, vocab-tiles)
# --------------------------------------------------------------------------
def final_kernel(x_ref, lnw_ref, lnb_ref, wlm_ref, o_ref):
    x = x_ref[0].astype(jnp.float32)                                # (tt, C)
    h = _layernorm(x, lnw_ref[...], lnb_ref[...]).astype(_MXU_DTYPE)
    o_ref[0] = jnp.dot(h, wlm_ref[...],
                       preferred_element_type=jnp.float32).astype(o_ref.dtype)


def gpt_final(x, lnf_w, lnf_b, w_lm, *, tt=None, tv=None):
    B, T, C = x.shape
    V = w_lm.shape[1]
    tt = min(T, 256) if tt is None else tt
    tv = min(V, 512) if tv is None else tv
    assert T % tt == 0 and V % tv == 0

    return pl.pallas_call(
        final_kernel,
        out_shape=jax.ShapeDtypeStruct((B, T, V), jnp.float32),
        grid=(B, T // tt, V // tv),
        in_specs=[pl.BlockSpec((1, tt, C), lambda b, ti, vi: (b, ti, 0)),
                  pl.BlockSpec((1, C), lambda b, ti, vi: (0, 0)),
                  pl.BlockSpec((1, C), lambda b, ti, vi: (0, 0)),
                  pl.BlockSpec((C, tv), lambda b, ti, vi: (0, vi))],
        out_specs=pl.BlockSpec((1, tt, tv), lambda b, ti, vi: (b, ti, vi)),
        compiler_params=pltpu.CompilerParams(
            dimension_semantics=("parallel", "parallel", "parallel"),
            vmem_limit_bytes=_VMEM_LIMIT),
    )(x, lnf_w, lnf_b, w_lm)


def model_part_final(x, layer_params, lnf_w, lnf_b, w_lm, *, n_head):
    """Equivalent of ModelPartFinal_GPT.forward."""
    for params in layer_params:
        x = gpt_block(x, params, n_head=n_head)
    return gpt_final(x, lnf_w, lnf_b, w_lm)


# --------------------------------------------------------------------------
# Parameter init (GPT-style, weights stored as (in, out); matmul weights bf16)
# --------------------------------------------------------------------------
def init_block_params(key, C):
    std = 0.02
    k_q, k_k, k_v, k_proj, k_fc, k_fcp = jax.random.split(key, 6)
    f32, bf = jnp.float32, _MXU_DTYPE
    ln1_w = jnp.ones((1, C), f32)
    ln1_b = jnp.zeros((1, C), f32)
    w_q = (jax.random.normal(k_q, (C, C), f32) * std).astype(bf)
    w_k = (jax.random.normal(k_k, (C, C), f32) * std).astype(bf)
    w_v = (jax.random.normal(k_v, (C, C), f32) * std).astype(bf)
    b_q = jnp.zeros((1, C), f32)
    b_k = jnp.zeros((1, C), f32)
    b_v = jnp.zeros((1, C), f32)
    w_proj = (jax.random.normal(k_proj, (C, C), f32) * std).astype(bf)
    b_proj = jnp.zeros((1, C), f32)
    ln2_w = jnp.ones((1, C), f32)
    ln2_b = jnp.zeros((1, C), f32)
    w_fc = (jax.random.normal(k_fc, (C, 4 * C), f32) * std).astype(bf)
    b_fc = jnp.zeros((1, 4 * C), f32)
    w_fcp = (jax.random.normal(k_fcp, (4 * C, C), f32) * std).astype(bf)
    b_fcp = jnp.zeros((1, C), f32)
    return [ln1_w, ln1_b, w_q, w_k, w_v, b_q, b_k, b_v, w_proj, b_proj,
            ln2_w, ln2_b, w_fc, b_fc, w_fcp, b_fcp]


if __name__ == "__main__":
    # Small config: batch=2, seq=8, n_embd=32, n_head=4, 2 final blocks,
    # vocab padded to a lane-dense 128.
    B, T, C = 2, 8, 32
    n_head = 4
    n_blocks = 2
    vocab = 128

    root = jax.random.PRNGKey(0)
    kx, klm, *layer_keys = jax.random.split(root, 2 + n_blocks)

    x = jax.random.normal(kx, (B, T, C), jnp.float32)
    layer_params = [init_block_params(k, C) for k in layer_keys]
    lnf_w = jnp.ones((1, C), jnp.float32)
    lnf_b = jnp.zeros((1, C), jnp.float32)
    w_lm = (jax.random.normal(klm, (C, vocab), jnp.float32) * 0.02).astype(_MXU_DTYPE)

    # TODO(synk): dropout inside attention/MLP is treated as 0 (eval mode).
    logits = model_part_final(x, layer_params, lnf_w, lnf_b, w_lm, n_head=n_head)
    jax.block_until_ready(logits)
    assert logits.shape == (B, T, vocab) and logits.dtype == jnp.float32
    print("KERNEL_OK")
</pallas_src>

<mosaic_0001>
module attributes {stable_mosaic.version = 11 : i64} {
  func.func @gpt_block_kernel(%arg0: i32, %arg1: i32, %arg2: memref<1x8x32xf32, #tpu.memory_space<vmem>>, %arg3: memref<1x32xf32, #tpu.memory_space<vmem>>, %arg4: memref<1x32xf32, #tpu.memory_space<vmem>>, %arg5: memref<32x32xbf16, #tpu.memory_space<vmem>>, %arg6: memref<32x32xbf16, #tpu.memory_space<vmem>>, %arg7: memref<32x32xbf16, #tpu.memory_space<vmem>>, %arg8: memref<1x32xf32, #tpu.memory_space<vmem>>, %arg9: memref<1x32xf32, #tpu.memory_space<vmem>>, %arg10: memref<1x32xf32, #tpu.memory_space<vmem>>, %arg11: memref<32x32xbf16, #tpu.memory_space<vmem>>, %arg12: memref<1x32xf32, #tpu.memory_space<vmem>>, %arg13: memref<1x32xf32, #tpu.memory_space<vmem>>, %arg14: memref<1x32xf32, #tpu.memory_space<vmem>>, %arg15: memref<32x128xbf16, #tpu.memory_space<vmem>>, %arg16: memref<1x128xf32, #tpu.memory_space<vmem>>, %arg17: memref<128x32xbf16, #tpu.memory_space<vmem>>, %arg18: memref<1x32xf32, #tpu.memory_space<vmem>>, %arg19: memref<1x8x32xf32, #tpu.memory_space<vmem>>) attributes {dimension_semantics = [#tpu.dimension_semantics<parallel>, #tpu.dimension_semantics<parallel>], iteration_bounds = array<i64: 2, 1>, scalar_prefetch = 0 : i64, scratch_operands = 0 : i64, tpu.core_type = #tpu.core_type<tc>, window_params = [{transform_indices = @transform_0, window_bounds = array<i64: 1, 8, 32>}, {pipeline_mode = #tpu.pipeline_mode<synchronous>, transform_indices = @transform_1, window_bounds = array<i64: 1, 32>}, {pipeline_mode = #tpu.pipeline_mode<synchronous>, transform_indices = @transform_2, window_bounds = array<i64: 1, 32>}, {pipeline_mode = #tpu.pipeline_mode<synchronous>, transform_indices = @transform_3, window_bounds = array<i64: 32, 32>}, {pipeline_mode = #tpu.pipeline_mode<synchronous>, transform_indices = @transform_4, window_bounds = array<i64: 32, 32>}, {pipeline_mode = #tpu.pipeline_mode<synchronous>, transform_indices = @transform_5, window_bounds = array<i64: 32, 32>}, {pipeline_mode = #tpu.pipeline_mode<synchronous>, transform_indices = @transform_6, window_bounds = array<i64: 1, 32>}, {pipeline_mode = #tpu.pipeline_mode<synchronous>, transform_indices = @transform_7, window_bounds = array<i64: 1, 32>}, {pipeline_mode = #tpu.pipeline_mode<synchronous>, transform_indices = @transform_8, window_bounds = array<i64: 1, 32>}, {pipeline_mode = #tpu.pipeline_mode<synchronous>, transform_indices = @transform_9, window_bounds = array<i64: 32, 32>}, {pipeline_mode = #tpu.pipeline_mode<synchronous>, transform_indices = @transform_10, window_bounds = array<i64: 1, 32>}, {pipeline_mode = #tpu.pipeline_mode<synchronous>, transform_indices = @transform_11, window_bounds = array<i64: 1, 32>}, {pipeline_mode = #tpu.pipeline_mode<synchronous>, transform_indices = @transform_12, window_bounds = array<i64: 1, 32>}, {pipeline_mode = #tpu.pipeline_mode<synchronous>, transform_indices = @transform_13, window_bounds = array<i64: 32, 128>}, {pipeline_mode = #tpu.pipeline_mode<synchronous>, transform_indices = @transform_14, window_bounds = array<i64: 1, 128>}, {pipeline_mode = #tpu.pipeline_mode<synchronous>, transform_indices = @transform_15, window_bounds = array<i64: 128, 32>}, {pipeline_mode = #tpu.pipeline_mode<synchronous>, transform_indices = @transform_16, window_bounds = array<i64: 1, 32>}, {transform_indices = @transform_17, window_bounds = array<i64: 1, 8, 32>}]} {
    %c8_i32 = arith.constant 8 : i32
    %0 = arith.muli %arg1, %c8_i32 : i32
    %1 = tpu.assume_multiple %0, 8 : i32
    %c0 = arith.constant 0 : index
    %2 = arith.index_cast %1 : i32 to index
    %c0_0 = arith.constant 0 : index
    %3 = vector.load %arg2[%c0, %2, %c0_0] : memref<1x8x32xf32, #tpu.memory_space<vmem>>, vector<1x8x32xf32>
    %4 = vector.shape_cast %3 : vector<1x8x32xf32> to vector<8x32xf32>
    %c0_1 = arith.constant 0 : index
    %c0_2 = arith.constant 0 : index
    %5 = vector.load %arg3[%c0_1, %c0_2] : memref<1x32xf32, #tpu.memory_space<vmem>>, vector<1x32xf32>
    %c0_3 = arith.constant 0 : index
    %c0_4 = arith.constant 0 : index
    %6 = vector.load %arg4[%c0_3, %c0_4] : memref<1x32xf32, #tpu.memory_space<vmem>>, vector<1x32xf32>
    %cst = arith.constant dense<0.000000e+00> : vector<8xf32>
    %7 = vector.multi_reduction <add>, %4, %cst [1] : vector<8x32xf32> to vector<8xf32>
    %8 = vector.shape_cast %7 : vector<8xf32> to vector<8x1xf32>
    %cst_5 = arith.constant 3.200000e+01 : f32
    %9 = vector.broadcast %cst_5 : f32 to vector<8x1xf32>
    %10 = arith.divf %8, %9 : vector<8x1xf32>
    %11 = vector.broadcast %10 : vector<8x1xf32> to vector<8x32xf32>
    %12 = arith.subf %4, %11 : vector<8x32xf32>
    %13 = arith.mulf %12, %12 : vector<8x32xf32>
    %cst_6 = arith.constant dense<0.000000e+00> : vector<8xf32>
    %14 = vector.multi_reduction <add>, %13, %cst_6 [1] : vector<8x32xf32> to vector<8xf32>
    %15 = vector.shape_cast %14 : vector<8xf32> to vector<8x1xf32>
    %cst_7 = arith.constant 3.200000e+01 : f32
    %16 = vector.broadcast %cst_7 : f32 to vector<8x1xf32>
    %17 = arith.divf %15, %16 : vector<8x1xf32>
    %18 = vector.broadcast %10 : vector<8x1xf32> to vector<8x32xf32>
    %19 = arith.subf %4, %18 : vector<8x32xf32>
    %cst_8 = arith.constant 9.99999974E-6 : f32
    %20 = vector.broadcast %cst_8 : f32 to vector<8x1xf32>
    %21 = arith.addf %17, %20 : vector<8x1xf32>
    %22 = math.rsqrt %21 : vector<8x1xf32>
    %23 = vector.broadcast %22 : vector<8x1xf32> to vector<8x32xf32>
    %24 = arith.mulf %19, %23 : vector<8x32xf32>
    %25 = vector.broadcast %5 : vector<1x32xf32> to vector<8x32xf32>
    %26 = arith.mulf %24, %25 : vector<8x32xf32>
    %27 = vector.broadcast %6 : vector<1x32xf32> to vector<8x32xf32>
    %28 = arith.addf %26, %27 : vector<8x32xf32>
    %29 = arith.truncf %28 : vector<8x32xf32> to vector<8x32xbf16>
    %c0_9 = arith.constant 0 : index
    %c0_10 = arith.constant 0 : index
    %30 = vector.load %arg5[%c0_9, %c0_10] : memref<32x32xbf16, #tpu.memory_space<vmem>>, vector<32x32xbf16>
    %cst_11 = arith.constant dense<0.000000e+00> : vector<8x32xf32>
    %31 = tpu.matmul %29, %30, %cst_11 {dimension_numbers = #tpu.dot_dimension_numbers<[1], [0], [0], [1], [0, 0, 1, 1], [], []>} : vector<8x32xbf16>, vector<32x32xbf16>, vector<8x32xf32> -> vector<8x32xf32>
    %c0_12 = arith.constant 0 : index
    %c0_13 = arith.constant 0 : index
    %32 = vector.load %arg8[%c0_12, %c0_13] : memref<1x32xf32, #tpu.memory_space<vmem>>, vector<1x32xf32>
    %33 = vector.broadcast %32 : vector<1x32xf32> to vector<8x32xf32>
    %34 = arith.addf %31, %33 : vector<8x32xf32>
    %35 = vector.shape_cast %34 : vector<8x32xf32> to vector<8x4x8xf32>
    %36 = tpu.transpose %35, [1, 0, 2] : vector<8x4x8xf32> -> vector<4x8x8xf32>
    %37 = arith.truncf %36 : vector<4x8x8xf32> to vector<4x8x8xbf16>
    %38 = tpu.iota {dimensions = array<i32: 0>} : vector<8x8xi32>
    %39 = vector.broadcast %1 : i32 to vector<8x8xi32>
    %40 = arith.addi %39, %38 : vector<8x8xi32>
    %41 = tpu.iota {dimensions = array<i32: 1>} : vector<8x8xi32>
    %cst_14 = arith.constant -1.000000e+30 : f32
    %42 = vector.broadcast %cst_14 : f32 to vector<4x8x1xf32>
    %cst_15 = arith.constant 0.000000e+00 : f32
    %43 = vector.broadcast %cst_15 : f32 to vector<4x8x1xf32>
    %cst_16 = arith.constant 0.000000e+00 : f32
    %44 = vector.broadcast %cst_16 : f32 to vector<4x8x8xf32>
    %c1_i32 = arith.constant 1 : i32
    %45 = arith.addi %arg1, %c1_i32 : i32
    %c0_i32 = arith.constant 0 : i32
    %46 = arith.subi %45, %c0_i32 : i32
    %47 = arith.addi %c0_i32, %46 : i32
    %c1_i32_17 = arith.constant 1 : i32
    %48:3 = scf.for %arg20 = %c0_i32 to %47 step %c1_i32_17 iter_args(%arg21 = %42, %arg22 = %43, %arg23 = %44) -> (vector<4x8x1xf32>, vector<4x8x1xf32>, vector<4x8x8xf32>)  : i32 {
      %c8_i32_48 = arith.constant 8 : i32
      %109 = arith.muli %arg20, %c8_i32_48 : i32
      %110 = tpu.assume_multiple %109, 8 : i32
      %c0_49 = arith.constant 0 : index
      %111 = arith.index_cast %110 : i32 to index
      %c0_50 = arith.constant 0 : index
      %112 = vector.load %arg2[%c0_49, %111, %c0_50] : memref<1x8x32xf32, #tpu.memory_space<vmem>>, vector<1x8x32xf32>
      %113 = vector.shape_cast %112 : vector<1x8x32xf32> to vector<8x32xf32>
      %c0_51 = arith.constant 0 : index
      %c0_52 = arith.constant 0 : index
      %114 = vector.load %arg3[%c0_51, %c0_52] : memref<1x32xf32, #tpu.memory_space<vmem>>, vector<1x32xf32>
      %c0_53 = arith.constant 0 : index
      %c0_54 = arith.constant 0 : index
      %115 = vector.load %arg4[%c0_53, %c0_54] : memref<1x32xf32, #tpu.memory_space<vmem>>, vector<1x32xf32>
      %cst_55 = arith.constant dense<0.000000e+00> : vector<8xf32>
      %116 = vector.multi_reduction <add>, %113, %cst_55 [1] : vector<8x32xf32> to vector<8xf32>
      %117 = vector.shape_cast %116 : vector<8xf32> to vector<8x1xf32>
      %cst_56 = arith.constant 3.200000e+01 : f32
      %118 = vector.broadcast %cst_56 : f32 to vector<8x1xf32>
      %119 = arith.divf %117, %118 : vector<8x1xf32>
      %120 = vector.broadcast %119 : vector<8x1xf32> to vector<8x32xf32>
      %121 = arith.subf %113, %120 : vector<8x32xf32>
      %122 = arith.mulf %121, %121 : vector<8x32xf32>
      %cst_57 = arith.constant dense<0.000000e+00> : vector<8xf32>
      %123 = vector.multi_reduction <add>, %122, %cst_57 [1] : vector<8x32xf32> to vector<8xf32>
      %124 = vector.shape_cast %123 : vector<8xf32> to vector<8x1xf32>
      %cst_58 = arith.constant 3.200000e+01 : f32
      %125 = vector.broadcast %cst_58 : f32 to vector<8x1xf32>
      %126 = arith.divf %124, %125 : vector<8x1xf32>
      %127 = vector.broadcast %119 : vector<8x1xf32> to vector<8x32xf32>
      %128 = arith.subf %113, %127 : vector<8x32xf32>
      %cst_59 = arith.constant 9.99999974E-6 : f32
      %129 = vector.broadcast %cst_59 : f32 to vector<8x1xf32>
      %130 = arith.addf %126, %129 : vector<8x1xf32>
      %131 = math.rsqrt %130 : vector<8x1xf32>
      %132 = vector.broadcast %131 : vector<8x1xf32> to vector<8x32xf32>
      %133 = arith.mulf %128, %132 : vector<8x32xf32>
      %134 = vector.broadcast %114 : vector<1x32xf32> to vector<8x32xf32>
      %135 = arith.mulf %133, %134 : vector<8x32xf32>
      %136 = vector.broadcast %115 : vector<1x32xf32> to vector<8x32xf32>
      %137 = arith.addf %135, %136 : vector<8x32xf32>
      %138 = arith.truncf %137 : vector<8x32xf32> to vector<8x32xbf16>
      %c0_60 = arith.constant 0 : index
      %c0_61 = arith.constant 0 : index
      %139 = vector.load %arg6[%c0_60, %c0_61] : memref<32x32xbf16, #tpu.memory_space<vmem>>, vector<32x32xbf16>
      %cst_62 = arith.constant dense<0.000000e+00> : vector<8x32xf32>
      %140 = tpu.matmul %138, %139, %cst_62 {dimension_numbers = #tpu.dot_dimension_numbers<[1], [0], [0], [1], [0, 0, 1, 1], [], []>} : vector<8x32xbf16>, vector<32x32xbf16>, vector<8x32xf32> -> vector<8x32xf32>
      %c0_63 = arith.constant 0 : index
      %c0_64 = arith.constant 0 : index
      %141 = vector.load %arg9[%c0_63, %c0_64] : memref<1x32xf32, #tpu.memory_space<vmem>>, vector<1x32xf32>
      %142 = vector.broadcast %141 : vector<1x32xf32> to vector<8x32xf32>
      %143 = arith.addf %140, %142 : vector<8x32xf32>
      %c0_65 = arith.constant 0 : index
      %c0_66 = arith.constant 0 : index
      %144 = vector.load %arg7[%c0_65, %c0_66] : memref<32x32xbf16, #tpu.memory_space<vmem>>, vector<32x32xbf16>
      %cst_67 = arith.constant dense<0.000000e+00> : vector<8x32xf32>
      %145 = tpu.matmul %138, %144, %cst_67 {dimension_numbers = #tpu.dot_dimension_numbers<[1], [0], [0], [1], [0, 0, 1, 1], [], []>} : vector<8x32xbf16>, vector<32x32xbf16>, vector<8x32xf32> -> vector<8x32xf32>
      %c0_68 = arith.constant 0 : index
      %c0_69 = arith.constant 0 : index
      %146 = vector.load %arg10[%c0_68, %c0_69] : memref<1x32xf32, #tpu.memory_space<vmem>>, vector<1x32xf32>
      %147 = vector.broadcast %146 : vector<1x32xf32> to vector<8x32xf32>
      %148 = arith.addf %145, %147 : vector<8x32xf32>
      %149 = vector.shape_cast %143 : vector<8x32xf32> to vector<8x4x8xf32>
      %150 = tpu.transpose %149, [1, 0, 2] : vector<8x4x8xf32> -> vector<4x8x8xf32>
      %151 = arith.truncf %150 : vector<4x8x8xf32> to vector<4x8x8xbf16>
      %152 = vector.shape_cast %148 : vector<8x32xf32> to vector<8x4x8xf32>
      %153 = tpu.transpose %152, [1, 0, 2] : vector<8x4x8xf32> -> vector<4x8x8xf32>
      %154 = arith.truncf %153 : vector<4x8x8xf32> to vector<4x8x8xbf16>
      "tpu.trace_start"() <{level = 10 : i32, message = "hqd,hkd->hqk"}> : () -> ()
      %cst_70 = arith.constant dense<0.000000e+00> : vector<4x8x8xf32>
      %155 = tpu.matmul %37, %151, %cst_70 {dimension_numbers = #tpu.dot_dimension_numbers<[2], [2], [1], [1], [0, 0, 0, 1, 1, 1], [0], [0]>} : vector<4x8x8xbf16>, vector<4x8x8xbf16>, vector<4x8x8xf32> -> vector<4x8x8xf32>
      "tpu.trace_stop"() : () -> ()
      %cst_71 = arith.constant 0.353553385 : f32
      %156 = vector.broadcast %cst_71 : f32 to vector<4x8x8xf32>
      %157 = arith.mulf %155, %156 : vector<4x8x8xf32>
      %158 = vector.broadcast %110 : i32 to vector<8x8xi32>
      %159 = arith.addi %158, %41 : vector<8x8xi32>
      %160 = arith.cmpi sle, %159, %40 : vector<8x8xi32>
      %161 = vector.shape_cast %160 : vector<8x8xi1> to vector<1x8x8xi1>
      %cst_72 = arith.constant -1.000000e+30 : f32
      %162 = vector.shape_cast %161 : vector<1x8x8xi1> to vector<1x8x8xi1>
      %163 = vector.broadcast %162 : vector<1x8x8xi1> to vector<4x8x8xi1>
      %164 = vector.broadcast %cst_72 : f32 to vector<4x8x8xf32>
      %165 = arith.select %163, %157, %164 : vector<4x8x8xi1>, vector<4x8x8xf32>
      %cst_73 = arith.constant dense<0xFF800000> : vector<4x8xf32>
      %166 = vector.multi_reduction <maximumf>, %165, %cst_73 [2] : vector<4x8x8xf32> to vector<4x8xf32>
      %167 = vector.shape_cast %166 : vector<4x8xf32> to vector<4x8x1xf32>
      %168 = arith.maximumf %arg21, %167 : vector<4x8x1xf32>
      %169 = arith.subf %arg21, %168 : vector<4x8x1xf32>
      %170 = math.exp %169 : vector<4x8x1xf32>
      %171 = vector.broadcast %168 : vector<4x8x1xf32> to vector<4x8x8xf32>
      %172 = arith.subf %165, %171 : vector<4x8x8xf32>
      %173 = math.exp %172 : vector<4x8x8xf32>
      %174 = arith.mulf %170, %arg22 : vector<4x8x1xf32>
      %cst_74 = arith.constant dense<0.000000e+00> : vector<4x8xf32>
      %175 = vector.multi_reduction <add>, %173, %cst_74 [2] : vector<4x8x8xf32> to vector<4x8xf32>
      %176 = vector.shape_cast %175 : vector<4x8xf32> to vector<4x8x1xf32>
      %177 = arith.addf %174, %176 : vector<4x8x1xf32>
      %178 = vector.broadcast %170 : vector<4x8x1xf32> to vector<4x8x8xf32>
      %179 = arith.mulf %178, %arg23 : vector<4x8x8xf32>
      %180 = arith.truncf %173 : vector<4x8x8xf32> to vector<4x8x8xbf16>
      "tpu.trace_start"() <{level = 10 : i32, message = "hqk,hkd->hqd"}> : () -> ()
      %cst_75 = arith.constant dense<0.000000e+00> : vector<4x8x8xf32>
      %181 = tpu.matmul %180, %154, %cst_75 {dimension_numbers = #tpu.dot_dimension_numbers<[2], [1], [1], [2], [0, 0, 0, 1, 1, 2], [0], [0]>} : vector<4x8x8xbf16>, vector<4x8x8xbf16>, vector<4x8x8xf32> -> vector<4x8x8xf32>
      "tpu.trace_stop"() : () -> ()
      %182 = arith.addf %179, %181 : vector<4x8x8xf32>
      scf.yield %168, %177, %182 : vector<4x8x1xf32>, vector<4x8x1xf32>, vector<4x8x8xf32>
    }
    %49 = tpu.reciprocal %48#1 {approx = true} : vector<4x8x1xf32> -> vector<4x8x1xf32>
    %50 = vector.broadcast %49 : vector<4x8x1xf32> to vector<4x8x8xf32>
    %51 = arith.mulf %48#2, %50 : vector<4x8x8xf32>
    %52 = tpu.transpose %51, [1, 0, 2] : vector<4x8x8xf32> -> vector<8x4x8xf32>
    %53 = vector.shape_cast %52 : vector<8x4x8xf32> to vector<8x32xf32>
    %54 = arith.truncf %53 : vector<8x32xf32> to vector<8x32xbf16>
    %c0_18 = arith.constant 0 : index
    %c0_19 = arith.constant 0 : index
    %55 = vector.load %arg11[%c0_18, %c0_19] : memref<32x32xbf16, #tpu.memory_space<vmem>>, vector<32x32xbf16>
    %cst_20 = arith.constant dense<0.000000e+00> : vector<8x32xf32>
    %56 = tpu.matmul %54, %55, %cst_20 {dimension_numbers = #tpu.dot_dimension_numbers<[1], [0], [0], [1], [0, 0, 1, 1], [], []>} : vector<8x32xbf16>, vector<32x32xbf16>, vector<8x32xf32> -> vector<8x32xf32>
    %c0_21 = arith.constant 0 : index
    %c0_22 = arith.constant 0 : index
    %57 = vector.load %arg12[%c0_21, %c0_22] : memref<1x32xf32, #tpu.memory_space<vmem>>, vector<1x32xf32>
    %58 = vector.broadcast %57 : vector<1x32xf32> to vector<8x32xf32>
    %59 = arith.addf %56, %58 : vector<8x32xf32>
    %60 = arith.addf %4, %59 : vector<8x32xf32>
    %c0_23 = arith.constant 0 : index
    %c0_24 = arith.constant 0 : index
    %61 = vector.load %arg13[%c0_23, %c0_24] : memref<1x32xf32, #tpu.memory_space<vmem>>, vector<1x32xf32>
    %c0_25 = arith.constant 0 : index
    %c0_26 = arith.constant 0 : index
    %62 = vector.load %arg14[%c0_25, %c0_26] : memref<1x32xf32, #tpu.memory_space<vmem>>, vector<1x32xf32>
    %cst_27 = arith.constant dense<0.000000e+00> : vector<8xf32>
    %63 = vector.multi_reduction <add>, %60, %cst_27 [1] : vector<8x32xf32> to vector<8xf32>
    %64 = vector.shape_cast %63 : vector<8xf32> to vector<8x1xf32>
    %cst_28 = arith.constant 3.200000e+01 : f32
    %65 = vector.broadcast %cst_28 : f32 to vector<8x1xf32>
    %66 = arith.divf %64, %65 : vector<8x1xf32>
    %67 = vector.broadcast %66 : vector<8x1xf32> to vector<8x32xf32>
    %68 = arith.subf %60, %67 : vector<8x32xf32>
    %69 = arith.mulf %68, %68 : vector<8x32xf32>
    %cst_29 = arith.constant dense<0.000000e+00> : vector<8xf32>
    %70 = vector.multi_reduction <add>, %69, %cst_29 [1] : vector<8x32xf32> to vector<8xf32>
    %71 = vector.shape_cast %70 : vector<8xf32> to vector<8x1xf32>
    %cst_30 = arith.constant 3.200000e+01 : f32
    %72 = vector.broadcast %cst_30 : f32 to vector<8x1xf32>
    %73 = arith.divf %71, %72 : vector<8x1xf32>
    %74 = vector.broadcast %66 : vector<8x1xf32> to vector<8x32xf32>
    %75 = arith.subf %60, %74 : vector<8x32xf32>
    %cst_31 = arith.constant 9.99999974E-6 : f32
    %76 = vector.broadcast %cst_31 : f32 to vector<8x1xf32>
    %77 = arith.addf %73, %76 : vector<8x1xf32>
    %78 = math.rsqrt %77 : vector<8x1xf32>
    %79 = vector.broadcast %78 : vector<8x1xf32> to vector<8x32xf32>
    %80 = arith.mulf %75, %79 : vector<8x32xf32>
    %81 = vector.broadcast %61 : vector<1x32xf32> to vector<8x32xf32>
    %82 = arith.mulf %80, %81 : vector<8x32xf32>
    %83 = vector.broadcast %62 : vector<1x32xf32> to vector<8x32xf32>
    %84 = arith.addf %82, %83 : vector<8x32xf32>
    %85 = arith.truncf %84 : vector<8x32xf32> to vector<8x32xbf16>
    %c0_32 = arith.constant 0 : index
    %c0_33 = arith.constant 0 : index
    %86 = vector.load %arg15[%c0_32, %c0_33] : memref<32x128xbf16, #tpu.memory_space<vmem>>, vector<32x128xbf16>
    %cst_34 = arith.constant dense<0.000000e+00> : vector<8x128xf32>
    %87 = tpu.matmul %85, %86, %cst_34 {dimension_numbers = #tpu.dot_dimension_numbers<[1], [0], [0], [1], [0, 0, 1, 1], [], []>} : vector<8x32xbf16>, vector<32x128xbf16>, vector<8x128xf32> -> vector<8x128xf32>
    %c0_35 = arith.constant 0 : index
    %c0_36 = arith.constant 0 : index
    %88 = vector.load %arg16[%c0_35, %c0_36] : memref<1x128xf32, #tpu.memory_space<vmem>>, vector<1x128xf32>
    %89 = vector.broadcast %88 : vector<1x128xf32> to vector<8x128xf32>
    %90 = arith.addf %87, %89 : vector<8x128xf32>
    %cst_37 = arith.constant 5.000000e-01 : f32
    %91 = vector.broadcast %cst_37 : f32 to vector<8x128xf32>
    %92 = arith.mulf %91, %90 : vector<8x128xf32>
    %cst_38 = arith.constant 0.707106769 : f32
    %93 = vector.broadcast %cst_38 : f32 to vector<8x128xf32>
    %94 = arith.mulf %90, %93 : vector<8x128xf32>
    %95 = math.erf %94 : vector<8x128xf32>
    %cst_39 = arith.constant 1.000000e+00 : f32
    %96 = vector.broadcast %cst_39 : f32 to vector<8x128xf32>
    %97 = arith.addf %96, %95 : vector<8x128xf32>
    %98 = arith.mulf %92, %97 : vector<8x128xf32>
    %99 = arith.truncf %98 : vector<8x128xf32> to vector<8x128xbf16>
    %c0_40 = arith.constant 0 : index
    %c0_41 = arith.constant 0 : index
    %100 = vector.load %arg17[%c0_40, %c0_41] : memref<128x32xbf16, #tpu.memory_space<vmem>>, vector<128x32xbf16>
    %cst_42 = arith.constant dense<0.000000e+00> : vector<8x32xf32>
    %101 = tpu.matmul %99, %100, %cst_42 {dimension_numbers = #tpu.dot_dimension_numbers<[1], [0], [0], [1], [0, 0, 1, 1], [], []>} : vector<8x128xbf16>, vector<128x32xbf16>, vector<8x32xf32> -> vector<8x32xf32>
    %c0_43 = arith.constant 0 : index
    %c0_44 = arith.constant 0 : index
    %102 = vector.load %arg18[%c0_43, %c0_44] : memref<1x32xf32, #tpu.memory_space<vmem>>, vector<1x32xf32>
    %103 = vector.broadcast %102 : vector<1x32xf32> to vector<8x32xf32>
    %104 = arith.addf %101, %103 : vector<8x32xf32>
    %105 = arith.addf %60, %104 : vector<8x32xf32>
    %c0_45 = arith.constant 0 : index
    %c0_46 = arith.constant 0 : index
    %c0_47 = arith.constant 0 : index
    %106 = vector.load %arg19[%c0_45, %c0_46, %c0_47] : memref<1x8x32xf32, #tpu.memory_space<vmem>>, vector<1x8x32xf32>
    %107 = vector.shape_cast %106 : vector<1x8x32xf32> to vector<8x32xf32>
    %108 = vector.shape_cast %105 : vector<8x32xf32> to vector<1x8x32xf32>
    tpu.vector_store %arg19[%c0_45, %c0_46, %c0_47], %108 {strides = array<i32>} : memref<1x8x32xf32, #tpu.memory_space<vmem>>, vector<1x8x32xf32>,
    return
  }
  func.func @transform_0(%arg0: i32, %arg1: i32) -> (i32, i32, i32) {
    %c0_i32 = arith.constant 0 : i32
    %c0_i32_0 = arith.constant 0 : i32
    %c0_i32_1 = arith.constant 0 : i32
    return %arg0, %c0_i32, %c0_i32_0 : i32, i32, i32
  }
  func.func @transform_1(%arg0: i32, %arg1: i32) -> (i32, i32) {
    %c0_i32 = arith.constant 0 : i32
    %c0_i32_0 = arith.constant 0 : i32
    %c0_i32_1 = arith.constant 0 : i32
    return %c0_i32, %c0_i32_0 : i32, i32
  }
  func.func @transform_2(%arg0: i32, %arg1: i32) -> (i32, i32) {
    %c0_i32 = arith.constant 0 : i32
    %c0_i32_0 = arith.constant 0 : i32
    %c0_i32_1 = arith.constant 0 : i32
    return %c0_i32, %c0_i32_0 : i32, i32
  }
  func.func @transform_3(%arg0: i32, %arg1: i32) -> (i32, i32) {
    %c0_i32 = arith.constant 0 : i32
    %c0_i32_0 = arith.constant 0 : i32
    %c0_i32_1 = arith.constant 0 : i32
    return %c0_i32, %c0_i32_0 : i32, i32
  }
  func.func @transform_4(%arg0: i32, %arg1: i32) -> (i32, i32) {
    %c0_i32 = arith.constant 0 : i32
    %c0_i32_0 = arith.constant 0 : i32
    %c0_i32_1 = arith.constant 0 : i32
    return %c0_i32, %c0_i32_0 : i32, i32
  }
  func.func @transform_5(%arg0: i32, %arg1: i32) -> (i32, i32) {
    %c0_i32 = arith.constant 0 : i32
    %c0_i32_0 = arith.constant 0 : i32
    %c0_i32_1 = arith.constant 0 : i32
    return %c0_i32, %c0_i32_0 : i32, i32
  }
  func.func @transform_6(%arg0: i32, %arg1: i32) -> (i32, i32) {
    %c0_i32 = arith.constant 0 : i32
    %c0_i32_0 = arith.constant 0 : i32
    %c0_i32_1 = arith.constant 0 : i32
    return %c0_i32, %c0_i32_0 : i32, i32
  }
  func.func @transform_7(%arg0: i32, %arg1: i32) -> (i32, i32) {
    %c0_i32 = arith.constant 0 : i32
    %c0_i32_0 = arith.constant 0 : i32
    %c0_i32_1 = arith.constant 0 : i32
    return %c0_i32, %c0_i32_0 : i32, i32
  }
  func.func @transform_8(%arg0: i32, %arg1: i32) -> (i32, i32) {
    %c0_i32 = arith.constant 0 : i32
    %c0_i32_0 = arith.constant 0 : i32
    %c0_i32_1 = arith.constant 0 : i32
    return %c0_i32, %c0_i32_0 : i32, i32
  }
  func.func @transform_9(%arg0: i32, %arg1: i32) -> (i32, i32) {
    %c0_i32 = arith.constant 0 : i32
    %c0_i32_0 = arith.constant 0 : i32
    %c0_i32_1 = arith.constant 0 : i32
    return %c0_i32, %c0_i32_0 : i32, i32
  }
  func.func @transform_10(%arg0: i32, %arg1: i32) -> (i32, i32) {
    %c0_i32 = arith.constant 0 : i32
    %c0_i32_0 = arith.constant 0 : i32
    %c0_i32_1 = arith.constant 0 : i32
    return %c0_i32, %c0_i32_0 : i32, i32
  }
  func.func @transform_11(%arg0: i32, %arg1: i32) -> (i32, i32) {
    %c0_i32 = arith.constant 0 : i32
    %c0_i32_0 = arith.constant 0 : i32
    %c0_i32_1 = arith.constant 0 : i32
    return %c0_i32, %c0_i32_0 : i32, i32
  }
  func.func @transform_12(%arg0: i32, %arg1: i32) -> (i32, i32) {
    %c0_i32 = arith.constant 0 : i32
    %c0_i32_0 = arith.constant 0 : i32
    %c0_i32_1 = arith.constant 0 : i32
    return %c0_i32, %c0_i32_0 : i32, i32
  }
  func.func @transform_13(%arg0: i32, %arg1: i32) -> (i32, i32) {
    %c0_i32 = arith.constant 0 : i32
    %c0_i32_0 = arith.constant 0 : i32
    %c0_i32_1 = arith.constant 0 : i32
    return %c0_i32, %c0_i32_0 : i32, i32
  }
  func.func @transform_14(%arg0: i32, %arg1: i32) -> (i32, i32) {
    %c0_i32 = arith.constant 0 : i32
    %c0_i32_0 = arith.constant 0 : i32
    %c0_i32_1 = arith.constant 0 : i32
    return %c0_i32, %c0_i32_0 : i32, i32
  }
  func.func @transform_15(%arg0: i32, %arg1: i32) -> (i32, i32) {
    %c0_i32 = arith.constant 0 : i32
    %c0_i32_0 = arith.constant 0 : i32
    %c0_i32_1 = arith.constant 0 : i32
    return %c0_i32, %c0_i32_0 : i32, i32
  }
  func.func @transform_16(%arg0: i32, %arg1: i32) -> (i32, i32) {
    %c0_i32 = arith.constant 0 : i32
    %c0_i32_0 = arith.constant 0 : i32
    %c0_i32_1 = arith.constant 0 : i32
    return %c0_i32, %c0_i32_0 : i32, i32
  }
  func.func @transform_17(%arg0: i32, %arg1: i32) -> (i32, i32, i32) {
    %c0_i32 = arith.constant 0 : i32
    %c0_i32_0 = arith.constant 0 : i32
    return %arg0, %arg1, %c0_i32 : i32, i32, i32
  }
}

</mosaic_0001>

<bundles_post_ra>
// kernel: tpu_custom_call.1
= control target key start
LH: loop header
LB: loop body
LE: loop exit
PB: predicated region body
PF: predicated region fallthrough
CT: control target
= control target key end

     0   :  { %s3729_s0 = inlined_call_operand.vmem [shape: f32[2,8,32], index: 0, kind: input, shape index: {}]   ;;  %s3730_s1 = inlined_call_operand.vmem [shape: f32[1,32], index: 1, kind: input, shape index: {}]   ;;  %s3731_s2 = inlined_call_operand.vmem [shape: f32[1,32], index: 2, kind: input, shape index: {}]   ;;  %s3732_s3 = inlined_call_operand.vmem [shape: bf16[32,32], index: 3, kind: input, shape index: {}]   ;;  %s3733_s4 = inlined_call_operand.vmem [shape: bf16[32,32], index: 4, kind: input, shape index: {}]   ;;  %s3734_s5 = inlined_call_operand.vmem [shape: bf16[32,32], index: 5, kind: input, shape index: {}]   ;;  %s3735_s6 = inlined_call_operand.vmem [shape: f32[1,32], index: 6, kind: input, shape index: {}]   ;;  %s3736_s7 = inlined_call_operand.vmem [shape: f32[1,32], index: 7, kind: input, shape index: {}]   ;;  %s3737_s8 = inlined_call_operand.vmem [shape: f32[1,32], index: 8, kind: input, shape index: {}]   ;;  %s3738_s9 = inlined_call_operand.vmem [shape: bf16[32,32], index: 9, kind: input, shape index: {}]   ;;  %s3739_s10 = inlined_call_operand.vmem [shape: f32[1,32], index: 10, kind: input, shape index: {}]   ;;  %s3740_s11 = inlined_call_operand.vmem [shape: f32[1,32], index: 11, kind: input, shape index: {}]   ;;  %s3741_s12 = inlined_call_operand.vmem [shape: f32[1,32], index: 12, kind: input, shape index: {}]   ;;  %s3742_s13 = inlined_call_operand.hbm [shape: bf16[32,128], index: 13, kind: input, shape index: {}]   ;;  %s3743_s14 = inlined_call_operand.vmem [shape: f32[1,128], index: 14, kind: input, shape index: {}]   ;;  %s3744_s15 = inlined_call_operand.vmem [shape: bf16[128,32], index: 15, kind: input, shape index: {}]   ;;  %s3745_s16 = inlined_call_operand.vmem [shape: f32[1,32], index: 16, kind: input, shape index: {}]   ;;  %s3746_s17 = inlined_call_operand.hbm [shape: f32[2,8,32], index: 17, kind: output, shape index: {}]  }
   0x1   :  { %3754 = sst [smem:[#allocation14_spill]] %s3729_s0 }
   0x2   :  { %3755 = sst [smem:[#allocation15_spill]] %s3730_s1 }
   0x3   :  { %22 = vsyncpa [#allocation3], 0 }
   0x4   :  { %23 = vsyncpa [#allocation4], 0 }
   0x5   :  { %25 = vsyncpa [#allocation4 + $0x1], 0  ;;  %s3123_s24 = smov 0   ;;  %s3125_s25 = smov 0  }
   0x6   :  { %s3127_s26 = smov 0   ;;  %s3129_s27 = smov 0  }
   0x7   :  { %s3131_s28 = smov 0   ;;  %s3133_s29 = smov 0  }
   0x8 LB: > { %3756 = sst [smem:[#allocation8_spill]] %s2940_s24  ;;  %s2352_s0 = sadd.s32 4294967295, %s2960_s29   ;;  %s2960_s29 = sphi %s3133_s29, %s31_s29   ;;  %s2956_s28 = sphi %s3131_s28, %s3791_s28   ;;  %s2952_s27 = sphi %s3129_s27, %s3790_s27   ;;  %s2948_s26 = sphi %s3127_s26, %s3789_s26   ;;  %s2944_s25 = sphi %s3125_s25, %s3793_s25   ;;  %s2940_s24 = sphi %s3123_s24, %s3792_s24  }
   0x9   : > { %3757 = sst [smem:[#allocation9_spill]] %s2948_s26  ;;  %s2353_s30 = sadd.s32 4294967294, %s2960_s29  }
   0xa   : > { %3758 = sst [smem:[#allocation10_spill]] %s2956_s28  ;;  %s43_s18 = sadd.s32 1, %s2956_s28 }
   0xb   : > { %s414_s19 = sadd.s32 1, %s2948_s26  ;;  %p45_p0 = scmp.ge.s32.totalorder %s43_s18, 2 }
   0xc   : > { %p424_p1 = scmp.ne.s32.totalorder %s2948_s26, %s2944_s25  ;;  %p425_p2 = scmp.eq.s32.totalorder %s2352_s0, 1 }
   0xd   : > { %p430_p3 = scmp.ne.s32.totalorder %s2944_s25, %s2940_s24  ;;  %s3795_s18 = smov (%p45_p0, %s43_s18), 0 }
   0xe   : > { %3759 = sst [smem:[#allocation11_spill]] %s3795_s18  ;;  %p3163_p4 = por %p425_p2, %p424_p1 }
   0xf   : > { %p431_p5 = scmp.eq.s32.totalorder %s2353_s30, 1  ;;  %s409_s20 = ssub.s32 %s2956_s28, %s3795_s18 }
  0x10   : > { %p2354_p6 = scmp.ge.s32.totalorder %s2960_s29, 1  ;;  %p412_p7 = scmp.eq.s32.totalorder %s409_s20, 0 }
  0x11   : > { %p3170_p8 = por %p431_p5, %p430_p3  ;;  %p438_p9 = scmp.lt.s32.totalorder %s2960_s29, 3 }
  0x12   : > { %s3176_s22 = scalar_select %p412_p7, %s2948_s26, %s414_s19  }
  0x13   : > { %s3761_s21 = scalar_select %p3170_p8, 1, 0 }
  0x14   : > { %3763 = sst [smem:[#allocation13_spill]] %s3176_s22  ;;  %p3178_p10 = pnand %p2354_p6, %p438_p9 }
  0x15   : > { %3762 = sst [smem:[#allocation12_spill]] %s3761_s21  ;;  %p3182_p11 = scmp.eq.s32.totalorder %s2352_s0, 0 }
  0x16   : > { %p2571_p12 = pneg %p3178_p10  ;;  %s3014_s30 = smov [#allocation2]  }
  0x17   : > { %s486_s20 = sshll.u32 %s3014_s30, 4  ;;  %s487_s20 = int_to_ptr.vmem [resolvable:$true] %s486_s20 }
  0x18   : > { %p2572_p13 = pnand %p3182_p11, %p2571_p12  ;;  %s2813_s19 = scalar_lea.vmem %s487_s20, 256 }
  0x19   : > { %p2814_p1 = scmp.ne.s32.totalorder %s487_s20, %s2813_s19  ;;  %p2821_p5 = scmp.lt.s32.totalorder %s487_s20, %s487_s20 }
  0x1a   : > { %p2804_p0 = pneg %p2572_p13  ;;  %p2822_p6 = scmp.lt.s32.totalorder %s2813_s19, %s2813_s19 }
  0x1c   : > { %p2816_p2 = pnand %p2814_p1, %p2804_p0  ;;  %p2823_p7 = por %p2822_p6, %p2821_p5 }
  0x1e   : > { %p2817_p3 = pneg %p2816_p2 }
  0x20   : > { %p2824_p9 = pnand %p2823_p7, %p2817_p3 }
  0x22   : > { %2827 = shalt.err (!%p2824_p9)
}
  0x23   : > { %s3015_s0 = smov 64   ;;  %s3016_s18 = smov 4  }
  0x24   : > { %2574 = dma.hbm_to_vmem [thread:$0]  (!%p2572_p13), %s3742_s13, 256, %s487_s20, [#allocation3], %s3015_s0, %s3015_s0, %s3016_s18  }
  0x25   : > { %518 = sbr.rel (%p3178_p10) target bundleno = 3006 (0xbbe), region = 88 }
  0x2a   : > { %2931 = dma.done.wait (%p3182_p11), [#allocation3], 256  }
  0x2b   : > { %2933 = vsyncadd (%p3182_p11), [#allocation3], 4294967040  ;;  %p569_p12 = scmp.lt.s32.totalorder %s2952_s27, 1  ;;  %s3766_s28 = sld [smem:[#allocation14_spill]]  ;;  %vm579_vm0 = vcmask 261120   ;;  %v2752_v7 = vld [vmem:[%s3732_s3 + $0x8] sm:$0xff]   ;;  %v690_v20 = vlaneseq }
  0x2c   : > { %s3752_s24 = sand.u32 1, %s2944_s25   ;;  %v3017_v8 = vmov 0.0   ;;  %vm3018_vm1 = vmmov 0   ;;  %v2753_v9 = vld [vmem:[%s3732_s3] sm:$0xff]   ;;  %s3019_s20 = smov 104  }
  0x2d   : > { %s570_s30 = scalar_select %p569_p12, %s2952_s27, 1  ;;  %2457 = vmatprep.subr.bf16.mxu0 %v3017_v8  ;;  %2461 = vmatprep.mubr.msk.bf16.mxu0 %vm3018_vm1, %v3017_v8  ;;  %v2362_v16 = vld [vmem:[%s3731_s2] ss:$0 sm:$0xff]  ;;  %v3235_v21 = vand.u32 127, %v690_v20  ;;  %v3022_v28 = vmov 1983009808  }
  0x2e   : > { %s3219_s22 = sshll.u32 %s3752_s24, 3  ;;  %2458 = vmatpush3.bf16.msra.mxu0 %v2752_v7  ;;  %v2363_v22 = vld [vmem:[%s3735_s6] ss:$0 sm:$0xff]  ;;  %s3020_s0 = smov 120   ;;  %v688_v29 = vunpack.c.l.s4 %v3022_v28  ;;  %v3023_v30 = vmov 1934713408  }
  0x2f   : > { %s2360_s19 = sshll.u32 %s570_s30, 3  ;;  %2459 = vmatprep.subr.bf16.mxu0 %v3017_v8  ;;  %s3021_s30 = smov 112   ;;  %v720_v31 = vunpack.c.l.s4 %v3023_v30  ;;  %v3240_v33 = vshrl.u32 %v690_v20, 7  ;;  %v3285_v20 = vmov 0.0   ;;  %v3299_v28 = vmov -1e+30  }
  0x30   : > { %v689_v32 = vunpack.c.0.s8 %v688_v29  ;;  %v3301_v29 = vmov -1e+30   ;;  %v3303_v30 = vmov -1e+30  }
  0x31   : > { %s3204_s18 = scalar_lea.vmem %s3766_s28, %s2360_s19  ;;  %s3767_s19 = sld [smem:[#allocation15_spill]]  ;;  %v721_v36 = vunpack.c.0.s8 %v720_v31 }
  0x32   : > { %v3207_v0 = vld [vmem:[%s3204_s18] sm:$0xff]  ;;  %2460 = vmatpush3.bf16.msra.mxu0 %v2753_v9  ;;  %v3243_v37 = vsub.s32 %v689_v32, %v3240_v33  ;;  %s3305_s28 = smov 0  }
  0x33   : > { %v580_v1 = vsel %vm579_vm0, %v3207_v0, 0.0  ;;  %v3246_v43 = vsub.s32 %v721_v36, %v3240_v33 }
  0x34   : > { %581 = vadd.xlane.f32.xlu0 %v580_v1 }
  0x37   : > { %v2361_v14 = vld [vmem:[%s3767_s19] ss:$0 sm:$0xff] }
  0xbd   : > { %v582_v2 = vpop.xlane.xlu0 %581 }
  0xbe   : > { %v584_v3 = vmul.f32 0.03125, %v582_v2 }
  0xc0   : > { %v585_v4 = vsub.f32 %v3207_v0, %v584_v3 }
  0xc2   : > { %v586_v5 = vmul.f32 %v585_v4, %v585_v4 }
  0xc4   : > { %v587_v6 = vsel %vm579_vm0, %v586_v5, 0.0 }
  0xc5   : > { %588 = vadd.xlane.f32.xlu0 %v587_v6 }
 0x14e   : > { %v589_v10 = vpop.xlane.xlu0 %588 }
 0x14f   : > { %v590_v11 = vmul.f32 0.03125, %v589_v10 }
 0x151   : > { %v591_v12 = vadd.f32 1e-05, %v590_v11 }
 0x153   : > { %2754 = vrsqrt.f32 %v591_v12 }
 0x160   : > { %v2755_v13 = vpop.eup %2754 }
 0x161   : > { %v593_v15 = vmul.f32 %v2755_v13, %v585_v4 }
 0x163   : > { %v600_v17 = vmul.f32 %v2361_v14, %v593_v15 }
 0x165   : > { %v607_v18 = vadd.f32 %v2362_v16, %v600_v17 }
 0x167   : > { %v608_v19 = vpack.c.bf16 %v607_v18, %v607_v18  ;;  %v3281_v18 = vmov 0.0  }
 0x169   : > { %2462 = vmatmul.mubr.msk.bf16.vlgmr.msra.gmra.mxu0 %vm579_vm0, %v608_v19  ;;  %v3283_v19 = vmov 0.0  }
 0x229   : > { %v669_v23 = vpop.f32.mrf.mxu0 }
 0x22a   : > { %v670_v24 = vadd.f32 %v2363_v22, %v669_v23  ;;  %v3287_v22 = vmov 0.0   ;;  %v3289_v23 = vmov 0.0  }
 0x22b   : > { %v2463_v25 = vpop.f32.mrf.mxu0 }
 0x22c   : > { %682 = vrot.lane.b32.xlu0 %v670_v24, %s3019_s20  ;;  %676 = vrot.lane.b32.xlu1 %v670_v24, %s3020_s0  ;;  %v3293_v25 = vmov 0.0  }
 0x22d   : > { %v672_v26 = vpop.f32.mrf.mxu0 }
 0x22e   : > { %v3295_v26 = vmov 0.0  }
 0x22f   : > { %v2464_v27 = vpop.f32.mrf.mxu0 }
 0x230   : > { %679 = vrot.lane.b32.xlu1 %v670_v24, %s3021_s30  ;;  %v3297_v27 = vmov -1e+30  }
 0x29e   : > { %v683_v34 = vpop.permute.xlu0 %682  ;;  %v677_v35 = vpop.permute.xlu1 %676 }
 0x29f   : > { %v701_v38 = vcombine.low %v677_v35, %v683_v34  ;;  %v702_v39 = vcombine.high %v677_v35, %v683_v34 }
 0x2a1   : > { %v709_v44 = vrot.slane %v701_v38, %v3243_v37  ;;  %v716_v45 = vrot.slane %v702_v39, %v3243_v37 }
 0x2a2   : > { %v680_v40 = vpop.permute.xlu1 %679 }
 0x2a3   : > { %v685_v41 = vcombine.low %v670_v24, %v680_v40  ;;  %v686_v42 = vcombine.high %v670_v24, %v680_v40  ;;  %v3291_v24 = vmov 0.0  }
 0x2a5   : > { %v693_v46 = vrot.slane %v685_v41, %v3243_v37  ;;  %v700_v47 = vrot.slane %v686_v42, %v3243_v37 }
 0x2a7   : > { %v717_v48 = vcombine.low %v693_v46, %v709_v44  ;;  %v718_v49 = vcombine.high %v693_v46, %v709_v44  ;;  %v733_v50 = vcombine.low %v700_v47, %v716_v45  ;;  %v734_v51 = vcombine.high %v700_v47, %v716_v45 }
 0x2a9   : > { %v725_v52 = vrot.slane %v717_v48, %v3246_v43  ;;  %v732_v53 = vrot.slane %v718_v49, %v3246_v43  ;;  %v741_v54 = vrot.slane %v733_v50, %v3246_v43  ;;  %v748_v55 = vrot.slane %v734_v51, %v3246_v43 }
 0x2ab   : > { %v753_v56 = vcombine.low %v725_v52, %v732_v53  ;;  %v2367_v57 = vcombine.high %v725_v52, %v732_v53  ;;  %v769_v58 = vcombine.low %v741_v54, %v748_v55  ;;  %v2368_v59 = vcombine.high %v741_v54, %v748_v55 }
 0x2ad   : > { %v760_v60 = vrot.slane %v753_v56, %v3243_v37  ;;  %v768_v61 = vrot.slane %v2367_v57, %v3243_v37  ;;  %v776_v62 = vrot.slane %v769_v58, %v3243_v37  ;;  %v784_v63 = vrot.slane %v2368_v59, %v3243_v37 }
 0x2af   : > { %v785_v1 = vcombine.low %v760_v60, %v768_v61  ;;  %v786_v2 = vcombine.high %v760_v60, %v768_v61  ;;  %v801_v3 = vcombine.low %v776_v62, %v784_v63  ;;  %v802_v4 = vcombine.high %v776_v62, %v784_v63 }
 0x2b1   : > { %v793_v5 = vrot.slane %v785_v1, %v3246_v43  ;;  %v800_v6 = vrot.slane %v786_v2, %v3246_v43  ;;  %v809_v7 = vrot.slane %v801_v3, %v3246_v43  ;;  %v816_v9 = vrot.slane %v802_v4, %v3246_v43 }
 0x2b3   : > { %v3264_v10 = vcombine.low %v793_v5, %v809_v7  ;;  %v3266_v11 = vcombine.high %v793_v5, %v809_v7  ;;  %v3268_v12 = vcombine.low %v800_v6, %v816_v9  ;;  %v3270_v13 = vcombine.high %v800_v6, %v816_v9 }
 0x2b5   : > { %v821_v14 = vpack.c.bf16 %v3264_v10, %v3264_v10  ;;  %v822_v15 = vpack.c.bf16 %v3266_v11, %v3266_v11  ;;  %v823_v16 = vpack.c.bf16 %v3268_v12, %v3268_v12  ;;  %v824_v17 = vpack.c.bf16 %v3270_v13, %v3270_v13 }
 0x2b6 LB: >> { %s3753_s26 = sshll.u32 %s3012_s28, 3  ;;  %v2756_v40 = vld [vmem:[%s3733_s4 + $0x8] sm:$0xff]   ;;  %v3024_v42 = vmov 0.0   ;;  %v2758_v44 = vld [vmem:[%s3733_s4] sm:$0xff]   ;;  %vm3025_vm2 = vmmov 0   ;;  %s3027_s24 = smov 120   ;;  %s3012_s28 = sphi %s3305_s28, %s835_s28   ;;  %v3008_v30 = vphi %v3303_v30, %v3782_v30   ;;  %v3004_v29 = vphi %v3301_v29, %v3781_v29   ;;  %v3000_v28 = vphi %v3299_v28, %v3780_v28   ;;  %v2996_v27 = vphi %v3297_v27, %v3779_v27   ;;  %v2992_v26 = vphi %v3295_v26, %v3778_v26   ;;  %v2988_v25 = vphi %v3293_v25, %v3777_v25   ;;  %v2984_v24 = vphi %v3291_v24, %v3776_v24   ;;  %v2980_v23 = vphi %v3289_v23, %v3775_v23   ;;  %v2976_v22 = vphi %v3287_v22, %v3774_v22   ;;  %v2972_v20 = vphi %v3285_v20, %v3773_v20   ;;  %v2968_v19 = vphi %v3283_v19, %v3772_v19   ;;  %v2964_v18 = vphi %v3281_v18, %v3771_v18  }
 0x2b7   : >> { %s851_s21 = scalar_lea.vmem %s3204_s18, %s3753_s26  ;;  %v2757_v41 = vld [vmem:[%s3734_s5 + $0x8] sm:$0xff]   ;;  %2465 = vmatprep.subr.bf16.mxu0 %v3024_v42  ;;  %2473 = vmatprep.subr.bf16.mxu1 %v3024_v42  ;;  %v2759_v45 = vld [vmem:[%s3734_s5] sm:$0xff]   ;;  %s3768_s26 = sld [smem:[#allocation15_spill]]  ;;  %vm1312_vm3 = vcmask 64512   ;;  %vm1581_vm5 = vcmask 1043456  }
 0x2b8   : >> { %v852_v31 = vld [vmem:[%s851_s21] sm:$0xff]  ;;  %2466 = vmatpush3.bf16.msra.mxu0 %v2756_v40  ;;  %2474 = vmatpush3.bf16.msra.mxu1 %v2757_v41  ;;  %s3026_s21 = smov 104   ;;  %s3028_s23 = smov 112  }
 0x2b9   : >> { %v855_v32 = vsel %vm579_vm0, %v852_v31, 0.0  ;;  %2467 = vmatprep.subr.bf16.mxu0 %v3024_v42  ;;  %2475 = vmatprep.subr.bf16.mxu1 %v3024_v42  ;;  %v2371_v52 = vld [vmem:[%s3731_s2] ss:$0 sm:$0xff]  ;;  %s3769_s20 = sshll.u32 %s3012_s28, 3  ;;  %s835_s28 = sadd.s32 1, %s3012_s28  }
 0x2ba   : >> { %856 = vadd.xlane.f32.xlu0 %v855_v32  ;;  %2469 = vmatprep.mubr.msk.bf16.mxu0 %vm3025_vm2, %v3024_v42  ;;  %v2372_v56 = vld [vmem:[%s3736_s7] ss:$0 sm:$0xff]  ;;  %p3546_p10 = scmp.ge.s32.totalorder %s835_s28, 1 }
 0x2bb   : >> { %2477 = vmatprep.mubr.msk.bf16.mxu1 %vm3025_vm2, %v3024_v42  ;;  %v2376_v1 = vld [vmem:[%s3737_s8] ss:$0 sm:$0xff]  ;;  %s3030_s19 = smov (%p3546_p10), 24   ;;  %vm1925_vm6 = vcmask (%p3546_p10), 130048   ;;  %vm1927_vm7 = vcmask (%p3546_p10), 195584   ;;  %s3032_s30 = smov (%p3546_p10), [#allocation5]  }
 0x2bc   : >> { %2468 = vmatpush3.bf16.msra.mxu0 %v2758_v44  ;;  %2476 = vmatpush3.bf16.msra.mxu1 %v2759_v45 }
 0x2bd   : >> { %2481 = vmatprep.subr.bf16.mxu0 %v3024_v42  ;;  %2487 = vmatprep.subr.bf16.mxu1 %v3024_v42  ;;  %v2370_v50 = vld [vmem:[%s3768_s26] ss:$0 sm:$0xff]  ;;  %s3031_s26 = smov (%p3546_p10), 16  }
 0x343   : >> { %v857_v34 = vpop.xlane.xlu0 %856 }
 0x344   : >> { %v858_v35 = vmul.f32 0.03125, %v857_v34 }
 0x346   : >> { %v859_v36 = vsub.f32 %v852_v31, %v858_v35 }
 0x348   : >> { %v860_v38 = vmul.f32 %v859_v36, %v859_v36 }
 0x34a   : >> { %v861_v39 = vsel %vm579_vm0, %v860_v38, 0.0 }
 0x34b   : >> { %862 = vadd.xlane.f32.xlu0 %v861_v39 }
 0x3d4   : >> { %v863_v46 = vpop.xlane.xlu0 %862 }
 0x3d5   : >> { %v864_v47 = vmul.f32 0.03125, %v863_v46 }
 0x3d7   : >> { %v865_v48 = vadd.f32 1e-05, %v864_v47 }
 0x3d9   : >> { %2760 = vrsqrt.f32 %v865_v48 }
 0x3e6   : >> { %v2761_v49 = vpop.eup %2760 }
 0x3e7   : >> { %v867_v51 = vmul.f32 %v2761_v49, %v859_v36 }
 0x3e9   : >> { %v874_v53 = vmul.f32 %v2370_v50, %v867_v51 }
 0x3eb   : >> { %v881_v54 = vadd.f32 %v2371_v52, %v874_v53 }
 0x3ed   : >> { %v882_v55 = vpack.c.bf16 %v881_v54, %v881_v54 }
 0x3ef   : >> { %2470 = vmatmul.mubr.msk.bf16.vlgmr.msra.gmra.mxu0 %vm579_vm0, %v882_v55  ;;  %2478 = vmatmul.mubr.msk.bf16.vlgmr.msra.gmra.mxu1 %vm579_vm0, %v882_v55 }
 0x3f0   : >> { %2483 = vmatprep.mubr.msk.bf16.mxu0 %vm3025_vm2, %v3024_v42  ;;  %2489 = vmatprep.mubr.msk.bf16.mxu1 %vm3025_vm2, %v3024_v42 }
 0x4af   : >> { %v943_v57 = vpop.f32.mrf.mxu0  ;;  %v1006_v58 = vpop.f32.mrf.mxu1 }
 0x4b0   : >> { %v944_v59 = vadd.f32 %v2372_v56, %v943_v57  ;;  %v3394_v4 = vadd.f32 %v2376_v1, %v1006_v58 }
 0x4b1   : >> { %v2471_v60 = vpop.f32.mrf.mxu0  ;;  %v2479_v61 = vpop.f32.mrf.mxu1 }
 0x4b2   : >> { %1019 = vrot.lane.b32.xlu0 %v944_v59, %s3026_s21  ;;  %1013 = vrot.lane.b32.xlu1 %v944_v59, %s3027_s24 }
 0x4b3   : >> { %v946_v62 = vpop.f32.mrf.mxu0  ;;  %v1009_v63 = vpop.f32.mrf.mxu1 }
 0x4b5   : >> { %v2472_v2 = vpop.f32.mrf.mxu0  ;;  %v2480_v3 = vpop.f32.mrf.mxu1 }
 0x4b6   : >> { %1016 = vrot.lane.b32.xlu1 %v944_v59, %s3028_s23 }
 0x4ba   : >> { %1163 = vrot.lane.b32.xlu1 %v3394_v4, %s3027_s24  ;;  %s3029_s24 = smov (%p3546_p10), 8  }
 0x524   : >> { %v1020_v5 = vpop.permute.xlu0 %1019  ;;  %v1014_v6 = vpop.permute.xlu1 %1013 }
 0x525   : >> { %v1038_v7 = vcombine.low %v1014_v6, %v1020_v5  ;;  %v1039_v9 = vcombine.high %v1014_v6, %v1020_v5 }
 0x527   : >> { %v1046_v35 = vrot.slane %v1038_v7, %v3243_v37  ;;  %v1053_v36 = vrot.slane %v1039_v9, %v3243_v37 }
 0x528   : >> { %v1017_v31 = vpop.permute.xlu1 %1016 }
 0x529   : >> { %v1022_v32 = vcombine.low %v944_v59, %v1017_v31  ;;  %v1023_v34 = vcombine.high %v944_v59, %v1017_v31 }
 0x52b   : >> { %v1030_v38 = vrot.slane %v1022_v32, %v3243_v37  ;;  %v1037_v39 = vrot.slane %v1023_v34, %v3243_v37 }
 0x52d   : >> { %v1054_v40 = vcombine.low %v1030_v38, %v1046_v35  ;;  %v1055_v41 = vcombine.high %v1030_v38, %v1046_v35  ;;  %v1070_v44 = vcombine.low %v1037_v39, %v1053_v36  ;;  %v1071_v45 = vcombine.high %v1037_v39, %v1053_v36 }
 0x52f   : >> { %v1062_v46 = vrot.slane %v1054_v40, %v3246_v43  ;;  %v1069_v47 = vrot.slane %v1055_v41, %v3246_v43  ;;  %v1078_v48 = vrot.slane %v1070_v44, %v3246_v43  ;;  %v1085_v49 = vrot.slane %v1071_v45, %v3246_v43 }
 0x530   : >> { %v1501_v40 = vstv %s3769_s20 }
 0x531   : >> { %v1090_v50 = vcombine.low %v1062_v46, %v1069_v47  ;;  %v2380_v51 = vcombine.high %v1062_v46, %v1069_v47  ;;  %v1106_v52 = vcombine.low %v1078_v48, %v1085_v49  ;;  %v2381_v53 = vcombine.high %v1078_v48, %v1085_v49 }
 0x532   : >> { %v1502_v41 = vadd.s32 %v1501_v40, %v3235_v21 }
 0x533   : >> { %v1097_v54 = vrot.slane %v1090_v50, %v3243_v37  ;;  %v1105_v55 = vrot.slane %v2380_v51, %v3243_v37  ;;  %v1113_v56 = vrot.slane %v1106_v52, %v3243_v37  ;;  %v1121_v57 = vrot.slane %v2381_v53, %v3243_v37 }
 0x534   : >> { %vm1503_vm4 = vcmp.le.s32.totalorder %v1502_v41, %v3240_v33 }
 0x535   : >> { %v1122_v58 = vcombine.low %v1097_v54, %v1105_v55  ;;  %v1138_v59 = vcombine.low %v1113_v56, %v1121_v57  ;;  %v1123_v60 = vcombine.high %v1097_v54, %v1105_v55  ;;  %v1139_v61 = vcombine.high %v1113_v56, %v1121_v57 }
 0x537   : >> { %v1130_v62 = vrot.slane %v1122_v58, %v3246_v43  ;;  %v1146_v63 = vrot.slane %v1138_v59, %v3246_v43  ;;  %v1137_v3 = vrot.slane %v1123_v60, %v3246_v43  ;;  %v1153_v5 = vrot.slane %v1139_v61, %v3246_v43 }
 0x539   : >> { %v1154_v1 = vcombine.low %v1130_v62, %v1146_v63  ;;  %v1155_v2 = vcombine.high %v1130_v62, %v1146_v63  ;;  %v1156_v32 = vcombine.low %v1137_v3, %v1153_v5  ;;  %v1157_v34 = vcombine.high %v1137_v3, %v1153_v5 }
 0x53b   : >> { %v1158_v6 = vpack.c.bf16 %v1154_v1, %v1154_v1  ;;  %v1159_v7 = vpack.c.bf16 %v1155_v2, %v1155_v2  ;;  %v1160_v35 = vpack.c.bf16 %v1156_v32, %v1156_v32  ;;  %v1161_v36 = vpack.c.bf16 %v1157_v34, %v1157_v34  ;;  %v1164_v32 = vpop.permute.xlu1 %1163 }
 0x53d   : >> { %v1317_v9 = vsel %vm1312_vm3, %v1158_v6, 0  ;;  %v1363_v31 = vsel %vm1312_vm3, %v1159_v7, 0  ;;  %v1409_v38 = vsel %vm1312_vm3, %v1160_v35, 0  ;;  %v1455_v39 = vsel %vm1312_vm3, %v1161_v36, 0 }
 0x53e   : >> { %2482 = vmatpush3.bf16.xpose.msra.mxu0 %v1317_v9  ;;  %2488 = vmatpush3.bf16.xpose.msra.mxu1 %v1363_v31 }
 0x53f   : >> { %2493 = vmatprep.subr.bf16.mxu0 %v3024_v42  ;;  %2499 = vmatprep.subr.bf16.mxu1 %v3024_v42 }
 0x545   : >> { %2484 = vmatmul.mubr.msk.bf16.vlgmr.msra.gmra.mxu0 %vm1312_vm3, %v821_v14  ;;  %2490 = vmatmul.mubr.msk.bf16.vlgmr.msra.gmra.mxu1 %vm1312_vm3, %v822_v15 }
 0x546   : >> { %2494 = vmatpush3.bf16.xpose.msra.mxu0 %v1409_v38  ;;  %2500 = vmatpush3.bf16.xpose.msra.mxu1 %v1455_v39 }
 0x547   : >> { %2495 = vmatprep.mubr.msk.bf16.mxu0 %vm3025_vm2, %v3024_v42  ;;  %2501 = vmatprep.mubr.msk.bf16.mxu1 %vm3025_vm2, %v3024_v42 }
 0x548   : >> { %2505 = vmatprep.subr.bf16.mxu0 %v3024_v42  ;;  %2511 = vmatprep.subr.bf16.mxu1 %v3024_v42 }
 0x54d   : >> { %2496 = vmatmul.mubr.msk.bf16.vlgmr.msra.gmra.mxu0 %vm1312_vm3, %v823_v16  ;;  %2502 = vmatmul.mubr.msk.bf16.vlgmr.msra.gmra.mxu1 %vm1312_vm3, %v824_v17 }
 0x54e   : >> { %2507 = vmatprep.mubr.msk.bf16.mxu0 %vm3025_vm2, %v3024_v42  ;;  %2513 = vmatprep.mubr.msk.bf16.mxu1 %vm3025_vm2, %v3024_v42 }
 0x605   : >> { %v1353_v44 = vpop.f32.mrf.mxu0  ;;  %v1399_v45 = vpop.f32.mrf.mxu1 }
 0x606   : >> { %v1497_v46 = vmul.f32 0.35355338, %v1353_v44  ;;  %v1498_v47 = vmul.f32 0.35355338, %v1399_v45 }
 0x607   : >> { %v2485_v48 = vpop.f32.mrf.mxu0  ;;  %v2491_v49 = vpop.f32.mrf.mxu1 }
 0x608   : >> { %v1507_v50 = vsel %vm1503_vm4, %v1498_v47, -1e+30  ;;  %v1506_v51 = vsel %vm1503_vm4, %v1497_v46, -1e+30 }
 0x609   : >> { %v1356_v52 = vpop.f32.mrf.mxu0  ;;  %v1402_v53 = vpop.f32.mrf.mxu1  ;;  %v1513_v54 = vsel %vm1312_vm3, %v1507_v50, -inf  ;;  %v1510_v55 = vsel %vm1312_vm3, %v1506_v51, -inf }
 0x60a   : >> { %1514 = vmax.xlane.f32.xlu0 %v1513_v54  ;;  %1511 = vmax.xlane.f32.xlu1 %v1510_v55 }
 0x60b   : >> { %v2486_v56 = vpop.f32.mrf.mxu0  ;;  %v2492_v57 = vpop.f32.mrf.mxu1 }
 0x60d   : >> { %v1445_v58 = vpop.f32.mrf.mxu0  ;;  %v1491_v59 = vpop.f32.mrf.mxu1 }
 0x60e   : >> { %v1499_v60 = vmul.f32 0.35355338, %v1445_v58  ;;  %v1500_v61 = vmul.f32 0.35355338, %v1491_v59 }
 0x60f   : >> { %v2497_v62 = vpop.f32.mrf.mxu0  ;;  %v2503_v63 = vpop.f32.mrf.mxu1 }
 0x610   : >> { %v1508_v1 = vsel %vm1503_vm4, %v1499_v60, -1e+30  ;;  %v1509_v2 = vsel %vm1503_vm4, %v1500_v61, -1e+30 }
 0x611   : >> { %v1448_v3 = vpop.f32.mrf.mxu0  ;;  %v1494_v5 = vpop.f32.mrf.mxu1  ;;  %v1516_v6 = vsel %vm1312_vm3, %v1508_v1, -inf  ;;  %v1519_v31 = vsel %vm1312_vm3, %v1509_v2, -inf }
 0x612   : >> { %1517 = vmax.xlane.f32.xlu1 %v1516_v6 }
 0x613   : >> { %v2498_v7 = vpop.f32.mrf.mxu0  ;;  %v2504_v9 = vpop.f32.mrf.mxu1 }
 0x616   : >> { %1520 = vmax.xlane.f32.xlu1 %v1519_v31 }
 0x620   : >> { %1166 = vrot.lane.b32.xlu0 %v3394_v4, %s3028_s23 }
 0x627   : >> { %1169 = vrot.lane.b32.xlu1 %v3394_v4, %s3026_s21  ;;  %s2414_s21 = sshll.u32 (%p3546_p10), %s2952_s27, 7  ;;  %s3785_s27 = sand.u32 (%p3546_p10), 1, %s2944_s25  }
 0x628   : > { %s3678_s20 = scalar_lea.hbm (%p3546_p10), %s3746_s17, %s2414_s21  ;;  %s2213_s18 = scalar_lea.sflag (%p3546_p10), [#allocation4], %s3785_s27 }
 0x629   : > { %s2832_s21 = sshll.u32 (%p3546_p10), %s3032_s30, 4  ;;  %s2833_s21 = int_to_ptr.vmem [resolvable:$false] %s2832_s21 }
 0x693   : >> { %v1515_v34 = vpop.xlane.xlu0 %1514  ;;  %v1512_v35 = vpop.xlane.xlu1 %1511 }
 0x694   : >> { %v3466_v36 = vmax.f32 %v3004_v29, %v1515_v34   ;;  %v3469_v38 = vmax.f32 %v3008_v30, %v1512_v35  }
 0x696   : >> { %v1527_v39 = vsub.f32 %v3004_v29, %v3466_v36  ;;  %v1539_v40 = vsub.f32 %v1507_v50, %v3466_v36  ;;  %v1526_v41 = vsub.f32 %v3008_v30, %v3469_v38  ;;  %v1538_v44 = vsub.f32 %v1506_v51, %v3469_v38 }
 0x697   : >> { %v1167_v53 = vpop.permute.xlu0 %1166 }
 0x698   : >> { %v1544_v45 = vmul.f32 1.442695, %v1539_v40  ;;  %v1542_v46 = vmul.f32 1.442695, %v1538_v44  ;;  %v1172_v51 = vcombine.low %v3394_v4, %v1167_v53  ;;  %v1173_v56 = vcombine.high %v3394_v4, %v1167_v53 }
 0x69a   : >> { %2762 = vpow2.f32 %v1544_v45  ;;  %v1180_v63 = vrot.slane %v1172_v51, %v3243_v37 }
 0x69b   : >> { %v1518_v47 = vpop.xlane.xlu1 %1517  ;;  %2764 = vpow2.f32 %v1542_v46 }
 0x69c   : >> { %v3478_v48 = vmax.f32 %v3000_v28, %v1518_v47  }
 0x69e   : >> { %v1528_v49 = vsub.f32 %v3000_v28, %v3478_v48  ;;  %v1540_v52 = vsub.f32 %v1508_v1, %v3478_v48  ;;  %v1187_v1 = vrot.slane %v1173_v56, %v3243_v37 }
 0x69f   : >> { %v1521_v50 = vpop.xlane.xlu1 %1520 }
 0x6a0   : >> { %v1546_v54 = vmul.f32 1.442695, %v1540_v52  ;;  %v3484_v55 = vmax.f32 %v2996_v27, %v1521_v50  }
 0x6a2   : >> { %v1529_v57 = vsub.f32 %v2996_v27, %v3484_v55  ;;  %v1541_v58 = vsub.f32 %v1509_v2, %v3484_v55  ;;  %2766 = vpow2.f32 %v1546_v54 }
 0x6a3   : >> { %v1170_v59 = vpop.permute.xlu1 %1169 }
 0x6a4   : >> { %v1548_v60 = vmul.f32 1.442695, %v1541_v58  ;;  %v1188_v61 = vcombine.low %v1164_v32, %v1170_v59  ;;  %v1189_v62 = vcombine.high %v1164_v32, %v1170_v59 }
 0x6a6   : >> { %v1196_v3 = vrot.slane %v1188_v61, %v3243_v37  ;;  %v1203_v5 = vrot.slane %v1189_v62, %v3243_v37  ;;  %2768 = vpow2.f32 %v1548_v60 }
 0x6a7   : >> { %v2763_v4 = vpop.eup %2762 }
 0x6a8   : >> { %v1204_v6 = vcombine.low %v1180_v63, %v1196_v3  ;;  %v1205_v7 = vcombine.high %v1180_v63, %v1196_v3  ;;  %v1220_v9 = vcombine.low %v1187_v1, %v1203_v5  ;;  %v1221_v31 = vcombine.high %v1187_v1, %v1203_v5  ;;  %v2765_v34 = vpop.eup %2764 }
 0x6a9   : >> { %v1557_v2 = vsel %vm1312_vm3, %v2763_v4, 0.0  ;;  %v1554_v45 = vsel %vm1312_vm3, %v2765_v34, 0.0 }
 0x6aa   : >> { %v1212_v35 = vrot.slane %v1204_v6, %v3246_v43  ;;  %v1219_v32 = vrot.slane %v1205_v7, %v3246_v43  ;;  %v1228_v40 = vrot.slane %v1220_v9, %v3246_v43  ;;  %v1235_v44 = vrot.slane %v1221_v31, %v3246_v43  ;;  %1558 = vadd.xlane.f32.xlu0 %v1557_v2 }
 0x6ab   : >> { %1555 = vadd.xlane.f32.xlu1 %v1554_v45 }
 0x6ac   : >> { %v1240_v46 = vcombine.low %v1212_v35, %v1219_v32  ;;  %v2382_v47 = vcombine.high %v1212_v35, %v1219_v32  ;;  %v1256_v52 = vcombine.low %v1228_v40, %v1235_v44  ;;  %v2383_v53 = vcombine.high %v1228_v40, %v1235_v44 }
 0x6ae   : >> { %v1247_v50 = vrot.slane %v1240_v46, %v3243_v37  ;;  %v1255_v54 = vrot.slane %v2382_v47, %v3243_v37  ;;  %v1263_v51 = vrot.slane %v1256_v52, %v3243_v37  ;;  %v1271_v56 = vrot.slane %v2383_v53, %v3243_v37 }
 0x6af   : >> { %v2767_v58 = vpop.eup %2766  ;;  %v1574_v53 = vpack.c.bf16 %v2765_v34, %v2765_v34 }
 0x6b0   : >> { %v1272_v59 = vcombine.low %v1247_v50, %v1255_v54  ;;  %v1288_v60 = vcombine.low %v1263_v51, %v1271_v56  ;;  %v1273_v61 = vcombine.high %v1247_v50, %v1255_v54  ;;  %v1289_v62 = vcombine.high %v1263_v51, %v1271_v56 }
 0x6b1   : >> { %v1560_v63 = vsel %vm1312_vm3, %v2767_v58, 0.0  ;;  %v1575_v50 = vpack.c.bf16 %v2763_v4, %v2763_v4  ;;  %v1576_v4 = vpack.c.bf16 %v2767_v58, %v2767_v58  ;;  %v1532_v56 = vmul.f32 1.442695, %v1527_v39 }
 0x6b2   : >> { %1561 = vadd.xlane.f32.xlu1 %v1560_v63  ;;  %v1280_v1 = vrot.slane %v1272_v59, %v3246_v43  ;;  %v1296_v3 = vrot.slane %v1288_v60, %v3246_v43  ;;  %v1287_v5 = vrot.slane %v1273_v61, %v3246_v43  ;;  %v1303_v6 = vrot.slane %v1289_v62, %v3246_v43 }
 0x6b3   : >> { %v2769_v7 = vpop.eup %2768  ;;  %v1530_v59 = vmul.f32 1.442695, %v1526_v41  ;;  %2770 = vpow2.f32 %v1532_v56  ;;  %v1536_v58 = vmul.f32 1.442695, %v1529_v57 }
 0x6b4   : >> { %v1304_v9 = vcombine.low %v1280_v1, %v1296_v3  ;;  %v1305_v31 = vcombine.high %v1280_v1, %v1296_v3  ;;  %v1306_v2 = vcombine.low %v1287_v5, %v1303_v6  ;;  %v1307_v35 = vcombine.high %v1287_v5, %v1303_v6 }
 0x6b5   : >> { %v1563_v32 = vsel %vm1312_vm3, %v2769_v7, 0.0  ;;  %v1577_v34 = vpack.c.bf16 %v2769_v7, %v2769_v7  ;;  %2772 = vpow2.f32 %v1530_v59 }
 0x6b6   : >> { %1564 = vadd.xlane.f32.xlu1 %v1563_v32  ;;  %v1308_v40 = vpack.c.bf16 %v1304_v9, %v1304_v9  ;;  %v1309_v44 = vpack.c.bf16 %v1305_v31, %v1305_v31  ;;  %v1310_v47 = vpack.c.bf16 %v1306_v2, %v1306_v2  ;;  %v1311_v52 = vpack.c.bf16 %v1307_v35, %v1307_v35 }
 0x6b8   : >> { %v1583_v45 = vsel %vm1581_vm5, %v1308_v40, 0  ;;  %v1629_v46 = vsel %vm1581_vm5, %v1309_v44, 0  ;;  %v1675_v54 = vsel %vm1581_vm5, %v1310_v47, 0  ;;  %v1721_v51 = vsel %vm1581_vm5, %v1311_v52, 0 }
 0x6b9   : >> { %2506 = vmatpush3.bf16.msra.mxu0 %v1583_v45  ;;  %2512 = vmatpush3.bf16.msra.mxu1 %v1629_v46 }
 0x6ba   : >> { %2517 = vmatprep.subr.bf16.mxu0 %v3024_v42  ;;  %2523 = vmatprep.subr.bf16.mxu1 %v3024_v42 }
 0x6bc   : >> { %2508 = vmatmul.mubr.msk.bf16.vlgmr.msra.gmra.mxu0 %vm1312_vm3, %v1574_v53  ;;  %2514 = vmatmul.mubr.msk.bf16.vlgmr.msra.gmra.mxu1 %vm1312_vm3, %v1575_v50 }
 0x6bd   : >> { %2518 = vmatpush3.bf16.msra.mxu0 %v1675_v54  ;;  %2524 = vmatpush3.bf16.msra.mxu1 %v1721_v51 }
 0x6be   : >> { %2519 = vmatprep.mubr.msk.bf16.mxu0 %vm3025_vm2, %v3024_v42  ;;  %2525 = vmatprep.mubr.msk.bf16.mxu1 %vm3025_vm2, %v3024_v42  ;;  %v1534_v42 = vmul.f32 1.442695, %v1528_v49 }
 0x6bf   : > { %2529 = vmatprep.subr.bf16.mxu1 (%p3546_p10), %v3017_v8  ;;  %2545 = vmatprep.subr.bf16.mxu0 (%p3546_p10), %v3017_v8 }
 0x6c0   : >> { %2774 = vpow2.f32 %v1534_v42  ;;  %v2771_v60 = vpop.eup %2770 }
 0x6c1   : >> { %2776 = vpow2.f32 %v1536_v58  ;;  %v1551_v29 = vmul.f32 %v2988_v25, %v2771_v60  ;;  %v1571_v25 = vmul.f32 %v2972_v20, %v2771_v60  ;;  %v2778_v60 = vld [vmem:[%s3738_s9 + $0x8] sm:$0xff] (%p3546_p10)  }
 0x6c2   : >> { %v2773_v61 = vpop.eup %2772 }
 0x6c3   : >> { %v1550_v30 = vmul.f32 %v2992_v26, %v2773_v61  ;;  %v1570_v7 = vmul.f32 %v2976_v22, %v2773_v61 }
 0x6c4   : >> { %2520 = vmatmul.mubr.msk.bf16.vlgmr.msra.gmra.mxu0 %vm1312_vm3, %v1576_v4  ;;  %2526 = vmatmul.mubr.msk.bf16.vlgmr.msra.gmra.mxu1 %vm1312_vm3, %v1577_v34 }
 0x6c5   : > { %2533 = vmatprep.mubr.msk.bf16.mxu1 (%p3546_p10), %vm3018_vm1, %v3017_v8  ;;  %2561 = vmatprep.mubr.msk.bf16.mxu0 (%p3546_p10), %vm3018_vm1, %v3017_v8 }
 0x6c6   : > { %2530 = vmatpush3.bf16.msra.mxu1 (%p3546_p10), %v2778_v60  ;;  %v2787_v60 = vld [vmem:[%s3744_s15 + $0x10] sm:$0xff] (%p3546_p10)  }
 0x6c7   : > { %2531 = vmatprep.subr.bf16.mxu1 (%p3546_p10), %v3017_v8 }
 0x6cd   : >> { %v2775_v1 = vpop.eup %2774 }
 0x6ce   : >> { %v1552_v28 = vmul.f32 %v2984_v24, %v2775_v1  ;;  %v2777_v49 = vpop.eup %2776  ;;  %v1572_v46 = vmul.f32 %v2968_v19, %v2775_v1 }
 0x6cf   : >> { %v1553_v27 = vmul.f32 %v2980_v23, %v2777_v49  ;;  %v1573_v23 = vmul.f32 %v2964_v18, %v2777_v49 }
 0x733   : >> { %v1559_v39 = vpop.xlane.xlu0 %1558 }
 0x734   : >> { %v1567_v41 = vadd.f32 %v1559_v39, %v1551_v29   ;;  %v1556_v62 = vpop.xlane.xlu1 %1555  ;;  %v3781_v29 = vmov %v3466_v36 }
 0x735   : >> { %v1566_v63 = vadd.f32 %v1556_v62, %v1550_v30   ;;  %v3782_v30 = vmov %v3469_v38 }
 0x737   : > { %2790 = vrcp.f32 (%p3546_p10), %v1566_v63 }
 0x738   : > { %2792 = vrcp.f32 (%p3546_p10), %v1567_v41 }
 0x73b   : >> { %v1562_v3 = vpop.xlane.xlu1 %1561 }
 0x73c   : >> { %v1568_v5 = vadd.f32 %v1562_v3, %v1552_v28   ;;  %v3780_v28 = vmov %v3478_v48 }
 0x73d   : > { %v2779_v28 = vld [vmem:[%s3738_s9] sm:$0xff] (%p3546_p10)  }
 0x73e   : > { %2794 = vrcp.f32 (%p3546_p10), %v1568_v5  ;;  %2532 = vmatpush3.bf16.msra.mxu1 (%p3546_p10), %v2779_v28 }
 0x73f   : >> { %v1565_v57 = vpop.xlane.xlu1 %1564  ;;  %2537 = vmatprep.subr.bf16.mxu1 (%p3546_p10), %v3017_v8 }
 0x740   : >> { %v1569_v6 = vadd.f32 %v1565_v57, %v1553_v27   ;;  %v3779_v27 = vmov %v3484_v55 }
 0x742   : > { %2796 = vrcp.f32 (%p3546_p10), %v1569_v6 }
 0x744   : > { %v2791_v36 = vpop.eup (%p3546_p10), %2790 }
 0x745   : > { %v2793_v38 = vpop.eup (%p3546_p10), %2792 }
 0x74b   : > { %v2795_v55 = vpop.eup (%p3546_p10), %2794 }
 0x74f   : > { %v2797_v59 = vpop.eup (%p3546_p10), %2796 }
 0x77c   : >> { %v1619_v9 = vpop.f32.mrf.mxu0  ;;  %v1665_v31 = vpop.f32.mrf.mxu1 }
 0x77d   : >> { %v1763_v2 = vadd.f32 %v1619_v9, %v1570_v7   ;;  %v1764_v35 = vadd.f32 %v1665_v31, %v1571_v25   ;;  %v3777_v25 = vmov %v1567_v41 }
 0x77e   : >> { %v2509_v26 = vpop.f32.mrf.mxu0  ;;  %v2515_v32 = vpop.f32.mrf.mxu1 }
 0x77f   : >> { %v3778_v26 = vmov %v1566_v63  ;;  %v1771_v48 = vmul.f32 (%p3546_p10), %v2791_v36, %v1763_v2  ;;  %v1772_v56 = vmul.f32 (%p3546_p10), %v2793_v38, %v1764_v35 }
 0x780   : >> { %v1622_v40 = vpop.f32.mrf.mxu0  ;;  %v1668_v44 = vpop.f32.mrf.mxu1 }
 0x782   : >> { %v2510_v24 = vpop.f32.mrf.mxu0  ;;  %v2516_v45 = vpop.f32.mrf.mxu1 }
 0x783   : >> { %v3776_v24 = vmov %v1568_v5 }
 0x784   : >> { %v1711_v47 = vpop.f32.mrf.mxu0  ;;  %v1757_v52 = vpop.f32.mrf.mxu1 }
 0x785   : >> { %v1765_v53 = vadd.f32 %v1711_v47, %v1572_v46   ;;  %v1766_v50 = vadd.f32 %v1757_v52, %v1573_v23   ;;  %v3775_v23 = vmov %v1569_v6  ;;  %v2394_v52 = vld [vmem:[%s3739_s10] ss:$0 sm:$0xff] (%p3546_p10) }
 0x786   : >> { %v2521_v22 = vpop.f32.mrf.mxu0  ;;  %v2527_v20 = vpop.f32.mrf.mxu1  ;;  %837 = sbr.rel (!%p3546_p10) target bundleno = 694 (0x2b6), region = 137 }
 0x787   : >> { %v3771_v18 = vmov %v1766_v50  ;;  %v3772_v19 = vmov %v1765_v53  ;;  %v3773_v20 = vmov %v1764_v35  ;;  %v3774_v22 = vmov %v1763_v2 }
 0x788   : >> { %v1714_v54 = vpop.f32.mrf.mxu0  ;;  %v1760_v51 = vpop.f32.mrf.mxu1  ;;  %v1773_v21 = vmul.f32 (%p3546_p10), %v2795_v55, %v1765_v53  ;;  %v1774_v33 = vmul.f32 (%p3546_p10), %v2797_v59, %v1766_v50  ;;  %v2781_v59 = vld [vmem:[#allocation2] sm:$0xff] (%p3546_p10)  }
 0x78a   : >> { %v2522_v4 = vpop.f32.mrf.mxu0  ;;  %v2528_v34 = vpop.f32.mrf.mxu1  ;;  %v1775_v10 = vcombine.low (%p3546_p10), %v1771_v48, %v1773_v21  ;;  %v1776_v11 = vcombine.high (%p3546_p10), %v1771_v48, %v1773_v21  ;;  %v1791_v12 = vcombine.low (%p3546_p10), %v1772_v56, %v1774_v33  ;;  %v1792_v13 = vcombine.high (%p3546_p10), %v1772_v56, %v1774_v33  ;;  %v2780_v56 = vld [vmem:[#allocation2 + $0x8] sm:$0xff] (%p3546_p10)   ;;  %v2783_v21 = vld [vmem:[%s3744_s15 + $0x30] sm:$0xff] (%p3546_p10)  }
 0x78c   : > { %v1783_v14 = vrot.slane %v1775_v10, %v3243_v37  ;;  %v1790_v15 = vrot.slane %v1776_v11, %v3243_v37  ;;  %v1799_v16 = vrot.slane %v1791_v12, %v3243_v37  ;;  %v1806_v17 = vrot.slane %v1792_v13, %v3243_v37  ;;  %v2398_v13 = vld [vmem:[%s3740_s11] ss:$0 sm:$0xff] }
 0x78e   : > { %v1807_v18 = vcombine.low %v1783_v14, %v1799_v16  ;;  %v1808_v19 = vcombine.high %v1783_v14, %v1799_v16  ;;  %v1823_v42 = vcombine.low %v1790_v15, %v1806_v17  ;;  %v1824_v58 = vcombine.high %v1790_v15, %v1806_v17  ;;  %v2399_v15 = vld [vmem:[%s3741_s12] ss:$0 sm:$0xff] }
 0x790   : > { %v1815_v61 = vrot.slane %v1807_v18, %v3246_v43  ;;  %v1822_v29 = vrot.slane %v1808_v19, %v3246_v43  ;;  %v1831_v39 = vrot.slane %v1823_v42, %v3246_v43  ;;  %v1838_v30 = vrot.slane %v1824_v58, %v3246_v43  ;;  %v2784_v19 = vld [vmem:[%s3744_s15 + $0x28] sm:$0xff]   ;;  %v2785_v42 = vld [vmem:[%s3744_s15 + $0x20] sm:$0xff]   ;;  %v2786_v58 = vld [vmem:[%s3744_s15 + $0x18] sm:$0xff]  }
 0x792   : > { %v1843_v41 = vcombine.low %v1815_v61, %v1822_v29  ;;  %v2392_v62 = vcombine.high %v1815_v61, %v1822_v29  ;;  %v1859_v63 = vcombine.low %v1831_v39, %v1838_v30  ;;  %v2393_v1 = vcombine.high %v1831_v39, %v1838_v30  ;;  %v2788_v61 = vld [vmem:[%s3744_s15 + $0x8] sm:$0xff]   ;;  %v2789_v29 = vld [vmem:[%s3744_s15] sm:$0xff]  }
 0x793   : > { %v2400_v39 = vld [vmem:[%s3743_s14] ss:$0 sm:$0xff] }
 0x794   : > { %v1850_v49 = vrot.slane %v1843_v41, %v3243_v37  ;;  %v1858_v3 = vrot.slane %v2392_v62, %v3243_v37  ;;  %v1866_v5 = vrot.slane %v1859_v63, %v3243_v37  ;;  %v1874_v27 = vrot.slane %v2393_v1, %v3243_v37 }
 0x796   : > { %v1875_v57 = vcombine.low %v1850_v49, %v1858_v3  ;;  %v1891_v6 = vcombine.low %v1866_v5, %v1874_v27  ;;  %v1876_v7 = vcombine.high %v1850_v49, %v1858_v3  ;;  %v1892_v25 = vcombine.high %v1866_v5, %v1874_v27 }
 0x798   : > { %v1883_v9 = vrot.slane %v1875_v57, %v3246_v43  ;;  %v1899_v31 = vrot.slane %v1891_v6, %v3246_v43  ;;  %v1890_v2 = vrot.slane %v1876_v7, %v3246_v43  ;;  %v1906_v35 = vrot.slane %v1892_v25, %v3246_v43  ;;  %v2404_v57 = vld [vmem:[%s3745_s16] ss:$0 sm:$0xff] }
 0x79a   : > { %v1908_v26 = vcombine.high %v1883_v9, %v1899_v31  ;;  %v1910_v32 = vcombine.high %v1890_v2, %v1906_v35  ;;  %v1907_v40 = vcombine.low %v1883_v9, %v1899_v31  ;;  %v1909_v37 = vcombine.low %v1890_v2, %v1906_v35 }
 0x79c   : > { %1912 = vrot.lane.b32.xlu0 %v1908_v26, %s3029_s24  ;;  %1920 = vrot.lane.b32.xlu1 %v1910_v32, %s3030_s19  ;;  %s3783_s24 = scalar_lea.vmem [#allocation5], %s3219_s22 }
 0x79d   : > { %s2227_s19 = sshll.u32 %s3783_s24, 4  ;;  %s3784_s0 = smov %s3783_s24  ;;  %s3680_s19 = int_to_ptr.vmem [resolvable:$true] %s2227_s19 }
 0x79e   : > { %s2828_s28 = scalar_lea.vmem %s3680_s19, 128  ;;  %s2834_s24 = scalar_lea.vmem %s2833_s21, 256 }
 0x79f   : > { %p2829_p11 = scmp.ne.s32.totalorder %s3680_s19, %s2828_s28  ;;  %p2835_p1 = scmp.lt.s32.totalorder %s3680_s19, %s2833_s21 }
 0x7a0   : > { %1916 = vrot.lane.b32.xlu0 %v1909_v37, %s3031_s26  ;;  %p2836_p2 = scmp.lt.s32.totalorder %s2834_s24, %s2828_s28 }
 0x7a1   : > { %p2830_p13 = pnand %p2829_p11, %p3163_p4 }
 0x7a2   : > { %p2837_p3 = por %p2836_p2, %p2835_p1 }
 0x7a3   : > { %p2831_p0 = pneg %p2830_p13 }
 0x7a5   : > { %p2838_p5 = pnand %p2837_p3, %p2831_p0 }
 0x80e   : > { %v1913_v44 = vpop.permute.xlu0 %1912  ;;  %v1921_v24 = vpop.permute.xlu1 %1920 }
 0x80f   : > { %v1924_v45 = vsel %vm1312_vm3, %v1907_v40, %v1913_v44 }
 0x812   : > { %v1917_v46 = vpop.permute.xlu0 %1916 }
 0x813   : > { %v1926_v23 = vsel %vm1925_vm6, %v1924_v45, %v1917_v46 }
 0x814   : > { %v1928_v47 = vsel %vm1927_vm7, %v1926_v23, %v1921_v24 }
 0x815   : > { %v1929_v43 = vpack.c.bf16 %v1928_v47, %v1928_v47 }
 0x817   : > { %2534 = vmatmul.mubr.msk.bf16.vlgmr.msra.gmra.mxu1 %vm579_vm0, %v1929_v43 }
 0x818   : > { %2541 = vmatprep.mubr.msk.bf16.mxu1 %vm3018_vm1, %v3017_v8  ;;  %2538 = vmatpush3.bf16.msra.mxu1 %v2780_v56 }
 0x819   : > { %2539 = vmatprep.subr.bf16.mxu1 %v3017_v8 }
 0x81c   : > { %2540 = vmatpush3.bf16.msra.mxu1 %v2781_v59 }
 0x8d7   : > { %v1990_v53 = vpop.f32.mrf.mxu1 }
 0x8d8   : > { %v1991_v50 = vadd.f32 %v2394_v52, %v1990_v53 }
 0x8d9   : > { %v2535_v22 = vpop.f32.mrf.mxu1 }
 0x8da   : > { %v3620_v20 = vadd.f32 %v1991_v50, %v3207_v0  ;;  %v2782_v0 = vld [vmem:[%s3744_s15 + $0x38] sm:$0xff]  }
 0x8db   : > { %v1993_v54 = vpop.f32.mrf.mxu1  ;;  %2546 = vmatpush3.bf16.msra.mxu0 %v2782_v0 }
 0x8dc   : > { %v1999_v51 = vsel %vm579_vm0, %v3620_v20, 0.0  ;;  %2547 = vmatprep.subr.bf16.mxu0 %v3017_v8 }
 0x8dd   : > { %2000 = vadd.xlane.f32.xlu1 %v1999_v51  ;;  %v2536_v4 = vpop.f32.mrf.mxu1 }
 0x8df   : > { %2548 = vmatpush3.bf16.msra.mxu0 %v2783_v21 }
 0x8e0   : > { %2549 = vmatprep.subr.bf16.mxu0 %v3017_v8 }
 0x8e3   : > { %2550 = vmatpush3.bf16.msra.mxu0 %v2784_v19 }
 0x8e4   : > { %2551 = vmatprep.subr.bf16.mxu0 %v3017_v8 }
 0x8e7   : > { %2552 = vmatpush3.bf16.msra.mxu0 %v2785_v42 }
 0x8e8   : > { %2553 = vmatprep.subr.bf16.mxu0 %v3017_v8 }
 0x8eb   : > { %2554 = vmatpush3.bf16.msra.mxu0 %v2786_v58 }
 0x8ec   : > { %2555 = vmatprep.subr.bf16.mxu0 %v3017_v8 }
 0x8ef   : > { %2556 = vmatpush3.bf16.msra.mxu0 %v2787_v60 }
 0x8f0   : > { %2557 = vmatprep.subr.bf16.mxu0 %v3017_v8 }
 0x8f3   : > { %2558 = vmatpush3.bf16.msra.mxu0 %v2788_v61 }
 0x8f4   : > { %2559 = vmatprep.subr.bf16.mxu0 %v3017_v8 }
 0x8f7   : > { %2560 = vmatpush3.bf16.msra.mxu0 %v2789_v29 }
 0x966   : > { %v2001_v34 = vpop.xlane.xlu1 %2000 }
 0x967   : > { %v2002_v36 = vmul.f32 0.03125, %v2001_v34 }
 0x969   : > { %v2003_v38 = vsub.f32 %v3620_v20, %v2002_v36 }
 0x96b   : > { %v2004_v48 = vmul.f32 %v2003_v38, %v2003_v38 }
 0x96d   : > { %v2005_v55 = vsel %vm579_vm0, %v2004_v48, 0.0 }
 0x96e   : > { %2006 = vadd.xlane.f32.xlu0 %v2005_v55 }
 0x9f7   : > { %v2007_v33 = vpop.xlane.xlu0 %2006 }
 0x9f8   : > { %v2008_v10 = vmul.f32 0.03125, %v2007_v33 }
 0x9fa   : > { %v2009_v11 = vadd.f32 1e-05, %v2008_v10 }
 0x9fc   : > { %2798 = vrsqrt.f32 %v2009_v11 }
 0xa09   : > { %v2799_v12 = vpop.eup %2798 }
 0xa0a   : > { %v2011_v14 = vmul.f32 %v2799_v12, %v2003_v38 }
 0xa0c   : > { %v2018_v16 = vmul.f32 %v2398_v13, %v2011_v14 }
 0xa0e   : > { %v2025_v17 = vadd.f32 %v2399_v15, %v2018_v16 }
 0xa10   : > { %v2026_v18 = vpack.c.bf16 %v2025_v17, %v2025_v17 }
 0xa12   : > { %2542 = vmatmul.mubr.msk.bf16.vlgmr.msra.gmra.mxu1 %vm579_vm0, %v2026_v18 }
 0xad2   : > { %v2087_v30 = vpop.f32.mrf.mxu1 }
 0xad3   : > { %v2088_v41 = vadd.f32 %v2400_v39, %v2087_v30 }
 0xad4   : > { %v2543_v62 = vpop.f32.mrf.mxu1 }
 0xad5   : > { %v2094_v63 = vmul.f32 0.70710677, %v2088_v41  ;;  %v2093_v3 = vmul.f32 0.5, %v2088_v41 }
 0xad6   : > { %v2090_v1 = vpop.f32.mrf.mxu1 }
 0xad7   : > { %2800 = verf.f32 %v2094_v63 }
 0xad8   : > { %v2544_v28 = vpop.f32.mrf.mxu1 }
 0xae4   : > { %v2801_v49 = vpop.eup %2800 }
 0xae5   : > { %v2096_v5 = vadd.f32 1.0, %v2801_v49 }
 0xae7   : > { %v2097_v8 = vmul.f32 %v2096_v5, %v2093_v3 }
 0xae9   : > { %v2098_v27 = vpack.c.bf16 %v2097_v8, %v2097_v8 }
 0xaeb   : > { %2562 = vmatmul.mubr.bf16.vlgmr.msra.gmra.mxu0 %v2098_v27 }
 0xbab   : > { %v2204_v6 = vpop.f32.mrf.mxu0 }
 0xbac   : > { %v2205_v7 = vadd.f32 %v2404_v57, %v2204_v6 }
 0xbad   : > { %v2563_v25 = vpop.f32.mrf.mxu0 }
 0xbae   : > { %v2210_v9 = vadd.f32 %v2205_v7, %v3620_v20 }
 0xbaf   : > { %v2207_v31 = vpop.f32.mrf.mxu0 }
 0xbb0   : > { %2211 = vst.msk [vmem:[%s3784_s0] sm:$0xff] %vm579_vm0, %v2210_v9 }
 0xbb1   : > { %v2564_v2 = vpop.f32.mrf.mxu0 }
 0xbb2   : > { %2841 = shalt.err (!%p2838_p5)
}
 0xbb3   : > { %s2842_s22 = scalar_lea.hbm %s3678_s20, 128  ;;  %s2846_s0 = scalar_lea.hbm %s3746_s17, 256 }
 0xbb4   : > { %p2843_p6 = scmp.ne.s32.totalorder %s3678_s20, %s2842_s22  ;;  %p2847_p12 = scmp.lt.s32.totalorder %s3678_s20, %s3746_s17 }
 0xbb5   : > { %p2848_p10 = scmp.lt.s32.totalorder %s2846_s0, %s2842_s22 }
 0xbb6   : > { %p2844_p7 = pnand %p2843_p6, %p3163_p4 }
 0xbb7   : > { %p2849_p11 = por %p2848_p10, %p2847_p12 }
 0xbb8   : > { %p2845_p9 = pneg %p2844_p7 }
 0xbba   : > { %p2850_p13 = pnand %p2849_p11, %p2845_p9 }
 0xbbc   : > { %2853 = shalt.err (!%p2850_p13)
}
 0xbbd   : > { %2569 = dma.vmem_to_hbm [thread:$0]  (%p3163_p4), %s3680_s19, 128, %s3678_s20, %s2213_s18  }
 0xbbe PF: > { %s3786_s28 = sld [smem:[#allocation8_spill]]  ;;  %p2581_p0 = scmp.ge.s32.totalorder %s2960_s29, 2 }
 0xbc0   : > { %p2576_p1 = pnand %p2581_p0, %p3170_p8 }
 0xbc2   : > { %p2577_p2 = pneg %p2576_p1 }
 0xbc4   : > { %s2239_s24 = sand.u32 1, %s3786_s28  }
 0xbc5   : > { %s2240_s26 = scalar_lea.sflag [#allocation4], %s2239_s24 }
 0xbc6   : > { %2935 = dma.done.wait (%p2577_p2), %s2240_s26, 128  }
 0xbc7   : > { %2937 = vsyncadd (%p2577_p2), %s2240_s26, 4294967168  ;;  %s31_s29 = sadd.s32 1, %s2960_s29   ;;  %s3788_s1 = sld [smem:[#allocation9_spill]] }
 0xbc8   : > { %p28_p3 = scmp.ge.s32.totalorder %s31_s29, 4   ;;  %s3789_s26 = sld [smem:[#allocation13_spill]] }
 0xbc9   : > { %s3790_s27 = sld [smem:[#allocation10_spill]]  ;;  %s3792_s24 = smov %s2944_s25 }
 0xbca   : > { %s3791_s28 = sld [smem:[#allocation11_spill]]  ;;  %30 = sbr.rel (!%p28_p3) target bundleno = 8 (0x8), region = 148 }
 0xbcd   : > { %s3793_s25 = smov %s3788_s1 }
 0xbcf   :  { %2245 = vsyncpa [#allocation3], 1 }
 0xbd0   :  { %2247 = vsyncpa [#allocation3 + $0x1], 1 }
 0xbd1   :  { %2248 = vsyncpa [#allocation4], 1 }
 0xbd2   :  { %2250 = vsyncpa [#allocation4 + $0x1], 1 }

</bundles_post_ra>
